<compile_context>
chip_gen: v7x
topology: tpu7x:2x2x1
jax: 0.10.0
libtpu: 0.0.40
codegen_flags: <defaults>
</compile_context>

<pallas_src>
import math

import jax
import jax.numpy as jnp
from jax.experimental import pallas as pl
from jax.experimental.pallas import tpu as pltpu

NEG_SLOPE = 0.1      # ActivationSelector default alpha for leaky_relu
EPS = 1e-5           # nn.LayerNorm default eps
NUM_BLOCKS = 3       # num_layers=6 -> 3 x (plain Sequential, ResidualBlock)


def _layernorm(x, g, b):
    mu = jnp.mean(x, axis=-1, keepdims=True)
    var = jnp.mean((x - mu) ** 2, axis=-1, keepdims=True)
    return (x - mu) * jax.lax.rsqrt(var + EPS) * g + b


def _leaky(x):
    return jnp.where(x >= 0, x, NEG_SLOPE * x)


# ---------------- packed operand layout ----------------
def _vec_layout():
    rows = ["in_g", "in_b", "bcomb", "post_g", "post_b"]
    for base in ("pb", "pg", "pbb", "rb1", "rg1", "rbb1", "rb2", "rg2", "rbb2"):
        rows += [f"{base}{i}" for i in range(NUM_BLOCKS)]
    rows += ["rf1b", "rf2b", "outb"]
    return {name: i for i, name in enumerate(rows)}


VEC_ROW = _vec_layout()
NUM_VEC_ROWS = len(VEC_ROW)                        # 35
VEC_ROWS_PADDED = ((NUM_VEC_ROWS + 7) // 8) * 8    # 40 (sublane-aligned)

# square-weight stack indices: [pw0..2 | rw1_0..2 | rw2_0..2 | rf1w]
SQ_PW, SQ_RW1, SQ_RW2, SQ_RF1 = 0, NUM_BLOCKS, 2 * NUM_BLOCKS, 3 * NUM_BLOCKS


# ---------------- kernel ----------------
def model_kernel(x_ref, wlin_ref, wpow_ref, w_sq_ref, rf2w_ref, outw_ref,
                 vecs_ref, o_ref):
    I = x_ref.shape[-1]
    H = w_sq_ref.shape[-1]
    H2 = rf2w_ref.shape[-1]
    O = o_ref.shape[-1]

    def row(name):                      # (1, H) f32 packed bias/affine row
        r = VEC_ROW[name]
        return vecs_ref[r:r + 1, :]

    def mm(a, w):                       # bf16 MXU matmul, f32 accumulation
        return jnp.dot(a.astype(jnp.bfloat16), w,
                       preferred_element_type=jnp.float32)

    x = x_ref[...]                      # (TB, I) f32

    # input LayerNorm
    x = _layernorm(x, row("in_g")[:, :I], row("in_b")[:, :I])

    # PowerSystemEmbedding with combine folded into the branch weights:
    #   x @ (Wlin @ Wc_a) + (x*x) @ (Wpow @ Wc_b) + bcomb'
    x = mm(x, wlin_ref[...]) + mm(x * x, wpow_ref[...]) + row("bcomb")

    # activation + LayerNorm (dropout == identity in eval)
    x = _layernorm(_leaky(x), row("post_g"), row("post_b"))

    # 6 layers = 3 x (plain Sequential, ResidualBlock) -- fully unrolled
    for i in range(NUM_BLOCKS):
        # plain: Linear -> LeakyReLU -> LayerNorm -> Dropout(identity)
        h = mm(x, w_sq_ref[SQ_PW + i]) + row(f"pb{i}")
        x = _layernorm(_leaky(h), row(f"pg{i}"), row(f"pbb{i}"))

        # residual block (use_layer_norm=True); scale folded into rg2/rbb2
        identity = x
        h = mm(x, w_sq_ref[SQ_RW1 + i]) + row(f"rb1{i}")
        h = _layernorm(_leaky(h), row(f"rg1{i}"), row(f"rbb1{i}"))
        h = mm(h, w_sq_ref[SQ_RW2 + i]) + row(f"rb2{i}")
        h = _layernorm(_leaky(h), row(f"rg2{i}"), row(f"rbb2{i}"))
        x = identity + h

    # refine head
    h = jnp.maximum(mm(x, w_sq_ref[SQ_RF1]) + row("rf1b"), 0.0)
    h = jnp.maximum(mm(h, rf2w_ref[...]) + row("rf2b")[:, :H2], 0.0)
    o_ref[...] = (mm(h, outw_ref[...]) + row("outb")[:, :O]).astype(o_ref.dtype)


# ---------------- parameter construction / packing ----------------
def init_params(key, input_dim, hidden_dim, output_dim):
    I, H, O = input_dim, hidden_dim, output_dim
    keys = jax.random.split(key, 10)

    def xavier(k, fan_in, fan_out, shape):
        limit = math.sqrt(6.0 / (fan_in + fan_out))
        return jax.random.uniform(k, shape, jnp.float32, -limit, limit)

    p = {}
    p["in_g"] = jnp.ones((1, I), jnp.float32)
    p["in_b"] = jnp.zeros((1, I), jnp.float32)
    p["wlin"] = xavier(keys[0], I, H, (I, H));  p["blin"] = jnp.zeros((1, H), jnp.float32)
    p["wpow"] = xavier(keys[1], I, H, (I, H));  p["bpow"] = jnp.zeros((1, H), jnp.float32)
    # combine: torch (H, 2H) -> split into two transposed (H, H) halves
    p["wcomb_a"] = xavier(keys[2], 2 * H, H, (H, H))
    p["wcomb_b"] = xavier(keys[3], 2 * H, H, (H, H))
    p["bcomb"] = jnp.zeros((1, H), jnp.float32)
    p["post_g"] = jnp.ones((1, H), jnp.float32)
    p["post_b"] = jnp.zeros((1, H), jnp.float32)
    # plain layers (layer indices 0, 2, 4)
    p["pw"] = xavier(keys[4], H, H, (3, H, H));   p["pb"] = jnp.zeros((3, 1, H), jnp.float32)
    p["pg"] = jnp.ones((3, 1, H), jnp.float32);   p["pbb"] = jnp.zeros((3, 1, H), jnp.float32)
    # residual blocks (layer indices 1, 3, 5)
    p["rw1"] = xavier(keys[5], H, H, (3, H, H));  p["rb1"] = jnp.zeros((3, 1, H), jnp.float32)
    p["rg1"] = jnp.ones((3, 1, H), jnp.float32);  p["rbb1"] = jnp.zeros((3, 1, H), jnp.float32)
    p["rw2"] = xavier(keys[6], H, H, (3, H, H));  p["rb2"] = jnp.zeros((3, 1, H), jnp.float32)
    p["rg2"] = jnp.ones((3, 1, H), jnp.float32);  p["rbb2"] = jnp.zeros((3, 1, H), jnp.float32)
    p["rscale"] = jnp.ones((1, 3), jnp.float32)   # ResidualBlock.scale params
    # refine / output head
    p["rf1w"] = xavier(keys[7], H, H, (H, H));           p["rf1b"] = jnp.zeros((1, H), jnp.float32)
    p["rf2w"] = xavier(keys[8], H, H // 2, (H, H // 2)); p["rf2b"] = jnp.zeros((1, H // 2), jnp.float32)
    p["outw"] = xavier(keys[9], H // 2, O, (H // 2, O)); p["outb"] = jnp.zeros((1, O), jnp.float32)
    return p


def pack_params(p):
    """One-time fold + pack of PyTorch-layout params into kernel operands."""
    H = p["wlin"].shape[1]

    # Fold the combine linear into the two embedding branches (exact algebra).
    wlin_f = p["wlin"] @ p["wcomb_a"]
    wpow_f = p["wpow"] @ p["wcomb_b"]
    bcomb_f = p["blin"] @ p["wcomb_a"] + p["bpow"] @ p["wcomb_b"] + p["bcomb"]

    # Fold the residual scale into the second LayerNorm affine params.
    scale = p["rscale"][0]                          # (3,)
    rg2_f = p["rg2"] * scale[:, None, None]
    rbb2_f = p["rbb2"] * scale[:, None, None]

    def pad_row(v):
        v = v.reshape(1, -1)
        return jnp.pad(v, ((0, 0), (0, H - v.shape[1])))

    rows = [None] * VEC_ROWS_PADDED

    def put(name, v):
        rows[VEC_ROW[name]] = pad_row(v)

    put("in_g", p["in_g"]); put("in_b", p["in_b"])
    put("bcomb", bcomb_f); put("post_g", p["post_g"]); put("post_b", p["post_b"])
    for i in range(NUM_BLOCKS):
        put(f"pb{i}", p["pb"][i]);   put(f"pg{i}", p["pg"][i]);   put(f"pbb{i}", p["pbb"][i])
        put(f"rb1{i}", p["rb1"][i]); put(f"rg1{i}", p["rg1"][i]); put(f"rbb1{i}", p["rbb1"][i])
        put(f"rb2{i}", p["rb2"][i]); put(f"rg2{i}", rg2_f[i]);    put(f"rbb2{i}", rbb2_f[i])
    put("rf1b", p["rf1b"]); put("rf2b", p["rf2b"]); put("outb", p["outb"])
    for k in range(NUM_VEC_ROWS, VEC_ROWS_PADDED):
        rows[k] = jnp.zeros((1, H), jnp.float32)
    vecs = jnp.concatenate(rows, axis=0)            # (40, H) f32

    w_sq = jnp.concatenate([p["pw"], p["rw1"], p["rw2"], p["rf1w"][None]], axis=0)

    return {
        "wlin": wlin_f.astype(jnp.bfloat16),        # (I, H)
        "wpow": wpow_f.astype(jnp.bfloat16),        # (I, H)
        "w_sq": w_sq.astype(jnp.bfloat16),          # (10, H, H)
        "rf2w": p["rf2w"].astype(jnp.bfloat16),     # (H, H//2)
        "outw": p["outw"].astype(jnp.bfloat16),     # (H//2, O)
        "vecs": vecs,                               # (40, H) f32
    }


# ---------------- wrapper ----------------
@jax.jit
def advanced_feedforward(x, packed):
    B, I = x.shape
    O = packed["outw"].shape[-1]
    TB = min(B, 256)                                # batch tile (B multiple of 8)

    def full_spec(a):
        nd = a.ndim
        return pl.BlockSpec(a.shape, lambda i, nd=nd: (0,) * nd)

    in_specs = [
        pl.BlockSpec((TB, I), lambda i: (i, 0)),
        full_spec(packed["wlin"]),
        full_spec(packed["wpow"]),
        full_spec(packed["w_sq"]),
        full_spec(packed["rf2w"]),
        full_spec(packed["outw"]),
        full_spec(packed["vecs"]),
    ]

    return pl.pallas_call(
        model_kernel,
        out_shape=jax.ShapeDtypeStruct((B, O), jnp.float32),
        grid=(pl.cdiv(B, TB),),
        in_specs=in_specs,
        out_specs=pl.BlockSpec((TB, O), lambda i: (i, 0)),
        compiler_params=pltpu.CompilerParams(dimension_semantics=("parallel",)),
    )(x, packed["wlin"], packed["wpow"], packed["w_sq"],
      packed["rf2w"], packed["outw"], packed["vecs"])


# ---------------- references for verification ----------------
def reference_f32(x, p):
    """Pure-JAX f32 mirror of the PyTorch forward (eval mode)."""
    x = _layernorm(x, p["in_g"], p["in_b"])
    lin = x @ p["wlin"] + p["blin"]
    pwr = (x * x) @ p["wpow"] + p["bpow"]
    x = lin @ p["wcomb_a"] + pwr @ p["wcomb_b"] + p["bcomb"]
    x = _layernorm(_leaky(x), p["post_g"], p["post_b"])
    for i in range(NUM_BLOCKS):
        h = x @ p["pw"][i] + p["pb"][i]
        x = _layernorm(_leaky(h), p["pg"][i], p["pbb"][i])
        identity = x
        h = x @ p["rw1"][i] + p["rb1"][i]
        h = _layernorm(_leaky(h), p["rg1"][i], p["rbb1"][i])
        h = h @ p["rw2"][i] + p["rb2"][i]
        h = _layernorm(_leaky(h), p["rg2"][i], p["rbb2"][i])
        x = identity + p["rscale"][0, i] * h
    h = jnp.maximum(x @ p["rf1w"] + p["rf1b"], 0.0)
    h = jnp.maximum(h @ p["rf2w"] + p["rf2b"], 0.0)
    return h @ p["outw"] + p["outb"]


def reference_bf16(x, p):
    """Mirror of the kernel's math (folded weights, bf16 dots, f32 accum)."""
    def mm(a, w):
        return jnp.dot(a.astype(jnp.bfloat16), w.astype(jnp.bfloat16),
                       preferred_element_type=jnp.float32)

    wlin_f = p["wlin"] @ p["wcomb_a"]
    wpow_f = p["wpow"] @ p["wcomb_b"]
    bcomb_f = p["blin"] @ p["wcomb_a"] + p["bpow"] @ p["wcomb_b"] + p["bcomb"]

    x = _layernorm(x, p["in_g"], p["in_b"])
    x = mm(x, wlin_f) + mm(x * x, wpow_f) + bcomb_f
    x = _layernorm(_leaky(x), p["post_g"], p["post_b"])
    for i in range(NUM_BLOCKS):
        h = mm(x, p["pw"][i]) + p["pb"][i]
        x = _layernorm(_leaky(h), p["pg"][i], p["pbb"][i])
        identity = x
        h = mm(x, p["rw1"][i]) + p["rb1"][i]
        h = _layernorm(_leaky(h), p["rg1"][i], p["rbb1"][i])
        h = mm(h, p["rw2"][i]) + p["rb2"][i]
        s = p["rscale"][0, i]
        h = _layernorm(_leaky(h), p["rg2"][i] * s, p["rbb2"][i] * s)
        x = identity + h
    h = jnp.maximum(mm(x, p["rf1w"]) + p["rf1b"], 0.0)
    h = jnp.maximum(mm(h, p["rf2w"]) + p["rf2b"], 0.0)
    return mm(h, p["outw"]) + p["outb"]


if __name__ == "__main__":
    B, INPUT_DIM, HIDDEN_DIM, OUTPUT_DIM = 8, 16, 64, 8

    key = jax.random.PRNGKey(0)
    kx, kp = jax.random.split(key)
    x = jax.random.normal(kx, (B, INPUT_DIM), jnp.float32)
    params = init_params(kp, INPUT_DIM, HIDDEN_DIM, OUTPUT_DIM)

    packed = pack_params(params)                 # one-time fold + pack
    out = advanced_feedforward(x, packed)
    out = jax.block_until_ready(out)
    assert out.shape == (B, OUTPUT_DIM)

    # Kernel fidelity: must match the bf16-matmul mirror of its own math.
    ref_b = reference_bf16(x, params)
    assert jnp.allclose(out, ref_b, atol=2e-2, rtol=2e-2), "mismatch vs bf16 reference"

    # Semantics preserved: close to the full-f32 PyTorch-equivalent forward
    # (looser tolerance accounts for bf16 matmul inputs; accumulation is f32).
    ref_f = reference_f32(x, params)
    assert jnp.allclose(out, ref_f, atol=1e-1, rtol=1e-1), "mismatch vs f32 reference"

    print("KERNEL_OK")
</pallas_src>

<mosaic_0001>
module attributes {stable_mosaic.version = 11 : i64} {
  func.func @model_kernel(%arg0: i32, %arg1: memref<8x16xf32, #tpu.memory_space<vmem>>, %arg2: memref<16x64xbf16, #tpu.memory_space<vmem>>, %arg3: memref<16x64xbf16, #tpu.memory_space<vmem>>, %arg4: memref<10x64x64xbf16, #tpu.memory_space<vmem>>, %arg5: memref<64x32xbf16, #tpu.memory_space<vmem>>, %arg6: memref<32x8xbf16, #tpu.memory_space<vmem>>, %arg7: memref<40x64xf32, #tpu.memory_space<vmem>>, %arg8: memref<8x8xf32, #tpu.memory_space<vmem>>) attributes {dimension_semantics = [#tpu.dimension_semantics<parallel>], iteration_bounds = array<i64: 1>, scalar_prefetch = 0 : i64, scratch_operands = 0 : i64, tpu.core_type = #tpu.core_type<tc>, window_params = [{transform_indices = @transform_0, window_bounds = array<i64: 8, 16>}, {pipeline_mode = #tpu.pipeline_mode<synchronous>, transform_indices = @transform_1, window_bounds = array<i64: 16, 64>}, {pipeline_mode = #tpu.pipeline_mode<synchronous>, transform_indices = @transform_2, window_bounds = array<i64: 16, 64>}, {pipeline_mode = #tpu.pipeline_mode<synchronous>, transform_indices = @transform_3, window_bounds = array<i64: 10, 64, 64>}, {pipeline_mode = #tpu.pipeline_mode<synchronous>, transform_indices = @transform_4, window_bounds = array<i64: 64, 32>}, {pipeline_mode = #tpu.pipeline_mode<synchronous>, transform_indices = @transform_5, window_bounds = array<i64: 32, 8>}, {pipeline_mode = #tpu.pipeline_mode<synchronous>, transform_indices = @transform_6, window_bounds = array<i64: 40, 64>}, {transform_indices = @transform_7, window_bounds = array<i64: 8, 8>}]} {
    %c0 = arith.constant 0 : index
    %c0_0 = arith.constant 0 : index
    %0 = vector.load %arg1[%c0, %c0_0] : memref<8x16xf32, #tpu.memory_space<vmem>>, vector<8x16xf32>
    %c0_1 = arith.constant 0 : index
    %c0_2 = arith.constant 0 : index
    %1 = vector.load %arg7[%c0_1, %c0_2] : memref<40x64xf32, #tpu.memory_space<vmem>>, vector<1x64xf32>
    %2 = vector.extract_strided_slice %1 {offsets = [0, 0], sizes = [1, 16], strides = [1, 1]} : vector<1x64xf32> to vector<1x16xf32>
    %c1 = arith.constant 1 : index
    %c0_3 = arith.constant 0 : index
    %3 = vector.load %arg7[%c1, %c0_3] : memref<40x64xf32, #tpu.memory_space<vmem>>, vector<1x64xf32>
    %4 = vector.extract_strided_slice %3 {offsets = [0, 0], sizes = [1, 16], strides = [1, 1]} : vector<1x64xf32> to vector<1x16xf32>
    %cst = arith.constant dense<0.000000e+00> : vector<8xf32>
    %5 = vector.multi_reduction <add>, %0, %cst [1] : vector<8x16xf32> to vector<8xf32>
    %6 = vector.shape_cast %5 : vector<8xf32> to vector<8x1xf32>
    %cst_4 = arith.constant 1.600000e+01 : f32
    %7 = vector.broadcast %cst_4 : f32 to vector<8x1xf32>
    %8 = arith.divf %6, %7 : vector<8x1xf32>
    %9 = vector.broadcast %8 : vector<8x1xf32> to vector<8x16xf32>
    %10 = arith.subf %0, %9 : vector<8x16xf32>
    %11 = arith.mulf %10, %10 : vector<8x16xf32>
    %cst_5 = arith.constant dense<0.000000e+00> : vector<8xf32>
    %12 = vector.multi_reduction <add>, %11, %cst_5 [1] : vector<8x16xf32> to vector<8xf32>
    %13 = vector.shape_cast %12 : vector<8xf32> to vector<8x1xf32>
    %cst_6 = arith.constant 1.600000e+01 : f32
    %14 = vector.broadcast %cst_6 : f32 to vector<8x1xf32>
    %15 = arith.divf %13, %14 : vector<8x1xf32>
    %16 = vector.broadcast %8 : vector<8x1xf32> to vector<8x16xf32>
    %17 = arith.subf %0, %16 : vector<8x16xf32>
    %cst_7 = arith.constant 9.99999974E-6 : f32
    %18 = vector.broadcast %cst_7 : f32 to vector<8x1xf32>
    %19 = arith.addf %15, %18 : vector<8x1xf32>
    %20 = math.rsqrt %19 : vector<8x1xf32>
    %21 = vector.broadcast %20 : vector<8x1xf32> to vector<8x16xf32>
    %22 = arith.mulf %17, %21 : vector<8x16xf32>
    %23 = vector.broadcast %2 : vector<1x16xf32> to vector<8x16xf32>
    %24 = arith.mulf %22, %23 : vector<8x16xf32>
    %25 = vector.broadcast %4 : vector<1x16xf32> to vector<8x16xf32>
    %26 = arith.addf %24, %25 : vector<8x16xf32>
    %c0_8 = arith.constant 0 : index
    %c0_9 = arith.constant 0 : index
    %27 = vector.load %arg2[%c0_8, %c0_9] : memref<16x64xbf16, #tpu.memory_space<vmem>>, vector<16x64xbf16>
    %28 = arith.truncf %26 : vector<8x16xf32> to vector<8x16xbf16>
    %cst_10 = arith.constant dense<0.000000e+00> : vector<8x64xf32>
    %29 = tpu.matmul %28, %27, %cst_10 {dimension_numbers = #tpu.dot_dimension_numbers<[1], [0], [0], [1], [0, 0, 1, 1], [], []>} : vector<8x16xbf16>, vector<16x64xbf16>, vector<8x64xf32> -> vector<8x64xf32>
    %30 = arith.mulf %26, %26 : vector<8x16xf32>
    %c0_11 = arith.constant 0 : index
    %c0_12 = arith.constant 0 : index
    %31 = vector.load %arg3[%c0_11, %c0_12] : memref<16x64xbf16, #tpu.memory_space<vmem>>, vector<16x64xbf16>
    %32 = arith.truncf %30 : vector<8x16xf32> to vector<8x16xbf16>
    %cst_13 = arith.constant dense<0.000000e+00> : vector<8x64xf32>
    %33 = tpu.matmul %32, %31, %cst_13 {dimension_numbers = #tpu.dot_dimension_numbers<[1], [0], [0], [1], [0, 0, 1, 1], [], []>} : vector<8x16xbf16>, vector<16x64xbf16>, vector<8x64xf32> -> vector<8x64xf32>
    %34 = arith.addf %29, %33 : vector<8x64xf32>
    %c2 = arith.constant 2 : index
    %c0_14 = arith.constant 0 : index
    %35 = vector.load %arg7[%c2, %c0_14] : memref<40x64xf32, #tpu.memory_space<vmem>>, vector<1x64xf32>
    %36 = vector.broadcast %35 : vector<1x64xf32> to vector<8x64xf32>
    %37 = arith.addf %34, %36 : vector<8x64xf32>
    %cst_15 = arith.constant 0.000000e+00 : f32
    %38 = vector.broadcast %cst_15 : f32 to vector<8x64xf32>
    %39 = arith.cmpf oge, %37, %38 : vector<8x64xf32>
    %cst_16 = arith.constant 1.000000e-01 : f32
    %40 = vector.broadcast %cst_16 : f32 to vector<8x64xf32>
    %41 = arith.mulf %40, %37 : vector<8x64xf32>
    %42 = arith.select %39, %37, %41 : vector<8x64xi1>, vector<8x64xf32>
    %c3 = arith.constant 3 : index
    %c0_17 = arith.constant 0 : index
    %43 = vector.load %arg7[%c3, %c0_17] : memref<40x64xf32, #tpu.memory_space<vmem>>, vector<1x64xf32>
    %c4 = arith.constant 4 : index
    %c0_18 = arith.constant 0 : index
    %44 = vector.load %arg7[%c4, %c0_18] : memref<40x64xf32, #tpu.memory_space<vmem>>, vector<1x64xf32>
    %cst_19 = arith.constant dense<0.000000e+00> : vector<8xf32>
    %45 = vector.multi_reduction <add>, %42, %cst_19 [1] : vector<8x64xf32> to vector<8xf32>
    %46 = vector.shape_cast %45 : vector<8xf32> to vector<8x1xf32>
    %cst_20 = arith.constant 6.400000e+01 : f32
    %47 = vector.broadcast %cst_20 : f32 to vector<8x1xf32>
    %48 = arith.divf %46, %47 : vector<8x1xf32>
    %49 = vector.broadcast %48 : vector<8x1xf32> to vector<8x64xf32>
    %50 = arith.subf %42, %49 : vector<8x64xf32>
    %51 = arith.mulf %50, %50 : vector<8x64xf32>
    %cst_21 = arith.constant dense<0.000000e+00> : vector<8xf32>
    %52 = vector.multi_reduction <add>, %51, %cst_21 [1] : vector<8x64xf32> to vector<8xf32>
    %53 = vector.shape_cast %52 : vector<8xf32> to vector<8x1xf32>
    %cst_22 = arith.constant 6.400000e+01 : f32
    %54 = vector.broadcast %cst_22 : f32 to vector<8x1xf32>
    %55 = arith.divf %53, %54 : vector<8x1xf32>
    %56 = vector.broadcast %48 : vector<8x1xf32> to vector<8x64xf32>
    %57 = arith.subf %42, %56 : vector<8x64xf32>
    %cst_23 = arith.constant 9.99999974E-6 : f32
    %58 = vector.broadcast %cst_23 : f32 to vector<8x1xf32>
    %59 = arith.addf %55, %58 : vector<8x1xf32>
    %60 = math.rsqrt %59 : vector<8x1xf32>
    %61 = vector.broadcast %60 : vector<8x1xf32> to vector<8x64xf32>
    %62 = arith.mulf %57, %61 : vector<8x64xf32>
    %63 = vector.broadcast %43 : vector<1x64xf32> to vector<8x64xf32>
    %64 = arith.mulf %62, %63 : vector<8x64xf32>
    %65 = vector.broadcast %44 : vector<1x64xf32> to vector<8x64xf32>
    %66 = arith.addf %64, %65 : vector<8x64xf32>
    %c0_24 = arith.constant 0 : index
    %c0_25 = arith.constant 0 : index
    %c0_26 = arith.constant 0 : index
    %67 = vector.load %arg4[%c0_24, %c0_25, %c0_26] : memref<10x64x64xbf16, #tpu.memory_space<vmem>>, vector<1x64x64xbf16>
    %68 = vector.shape_cast %67 : vector<1x64x64xbf16> to vector<64x64xbf16>
    %69 = arith.truncf %66 : vector<8x64xf32> to vector<8x64xbf16>
    %cst_27 = arith.constant dense<0.000000e+00> : vector<8x64xf32>
    %70 = tpu.matmul %69, %68, %cst_27 {dimension_numbers = #tpu.dot_dimension_numbers<[1], [0], [0], [1], [0, 0, 1, 1], [], []>} : vector<8x64xbf16>, vector<64x64xbf16>, vector<8x64xf32> -> vector<8x64xf32>
    %c5 = arith.constant 5 : index
    %c0_28 = arith.constant 0 : index
    %71 = vector.load %arg7[%c5, %c0_28] : memref<40x64xf32, #tpu.memory_space<vmem>>, vector<1x64xf32>
    %72 = vector.broadcast %71 : vector<1x64xf32> to vector<8x64xf32>
    %73 = arith.addf %70, %72 : vector<8x64xf32>
    %cst_29 = arith.constant 0.000000e+00 : f32
    %74 = vector.broadcast %cst_29 : f32 to vector<8x64xf32>
    %75 = arith.cmpf oge, %73, %74 : vector<8x64xf32>
    %cst_30 = arith.constant 1.000000e-01 : f32
    %76 = vector.broadcast %cst_30 : f32 to vector<8x64xf32>
    %77 = arith.mulf %76, %73 : vector<8x64xf32>
    %78 = arith.select %75, %73, %77 : vector<8x64xi1>, vector<8x64xf32>
    %c8 = arith.constant 8 : index
    %c0_31 = arith.constant 0 : index
    %79 = vector.load %arg7[%c8, %c0_31] : memref<40x64xf32, #tpu.memory_space<vmem>>, vector<1x64xf32>
    %c11 = arith.constant 11 : index
    %c0_32 = arith.constant 0 : index
    %80 = vector.load %arg7[%c11, %c0_32] : memref<40x64xf32, #tpu.memory_space<vmem>>, vector<1x64xf32>
    %cst_33 = arith.constant dense<0.000000e+00> : vector<8xf32>
    %81 = vector.multi_reduction <add>, %78, %cst_33 [1] : vector<8x64xf32> to vector<8xf32>
    %82 = vector.shape_cast %81 : vector<8xf32> to vector<8x1xf32>
    %cst_34 = arith.constant 6.400000e+01 : f32
    %83 = vector.broadcast %cst_34 : f32 to vector<8x1xf32>
    %84 = arith.divf %82, %83 : vector<8x1xf32>
    %85 = vector.broadcast %84 : vector<8x1xf32> to vector<8x64xf32>
    %86 = arith.subf %78, %85 : vector<8x64xf32>
    %87 = arith.mulf %86, %86 : vector<8x64xf32>
    %cst_35 = arith.constant dense<0.000000e+00> : vector<8xf32>
    %88 = vector.multi_reduction <add>, %87, %cst_35 [1] : vector<8x64xf32> to vector<8xf32>
    %89 = vector.shape_cast %88 : vector<8xf32> to vector<8x1xf32>
    %cst_36 = arith.constant 6.400000e+01 : f32
    %90 = vector.broadcast %cst_36 : f32 to vector<8x1xf32>
    %91 = arith.divf %89, %90 : vector<8x1xf32>
    %92 = vector.broadcast %84 : vector<8x1xf32> to vector<8x64xf32>
    %93 = arith.subf %78, %92 : vector<8x64xf32>
    %cst_37 = arith.constant 9.99999974E-6 : f32
    %94 = vector.broadcast %cst_37 : f32 to vector<8x1xf32>
    %95 = arith.addf %91, %94 : vector<8x1xf32>
    %96 = math.rsqrt %95 : vector<8x1xf32>
    %97 = vector.broadcast %96 : vector<8x1xf32> to vector<8x64xf32>
    %98 = arith.mulf %93, %97 : vector<8x64xf32>
    %99 = vector.broadcast %79 : vector<1x64xf32> to vector<8x64xf32>
    %100 = arith.mulf %98, %99 : vector<8x64xf32>
    %101 = vector.broadcast %80 : vector<1x64xf32> to vector<8x64xf32>
    %102 = arith.addf %100, %101 : vector<8x64xf32>
    %c3_38 = arith.constant 3 : index
    %c0_39 = arith.constant 0 : index
    %c0_40 = arith.constant 0 : index
    %103 = vector.load %arg4[%c3_38, %c0_39, %c0_40] : memref<10x64x64xbf16, #tpu.memory_space<vmem>>, vector<1x64x64xbf16>
    %104 = vector.shape_cast %103 : vector<1x64x64xbf16> to vector<64x64xbf16>
    %105 = arith.truncf %102 : vector<8x64xf32> to vector<8x64xbf16>
    %cst_41 = arith.constant dense<0.000000e+00> : vector<8x64xf32>
    %106 = tpu.matmul %105, %104, %cst_41 {dimension_numbers = #tpu.dot_dimension_numbers<[1], [0], [0], [1], [0, 0, 1, 1], [], []>} : vector<8x64xbf16>, vector<64x64xbf16>, vector<8x64xf32> -> vector<8x64xf32>
    %c14 = arith.constant 14 : index
    %c0_42 = arith.constant 0 : index
    %107 = vector.load %arg7[%c14, %c0_42] : memref<40x64xf32, #tpu.memory_space<vmem>>, vector<1x64xf32>
    %108 = vector.broadcast %107 : vector<1x64xf32> to vector<8x64xf32>
    %109 = arith.addf %106, %108 : vector<8x64xf32>
    %cst_43 = arith.constant 0.000000e+00 : f32
    %110 = vector.broadcast %cst_43 : f32 to vector<8x64xf32>
    %111 = arith.cmpf oge, %109, %110 : vector<8x64xf32>
    %cst_44 = arith.constant 1.000000e-01 : f32
    %112 = vector.broadcast %cst_44 : f32 to vector<8x64xf32>
    %113 = arith.mulf %112, %109 : vector<8x64xf32>
    %114 = arith.select %111, %109, %113 : vector<8x64xi1>, vector<8x64xf32>
    %c17 = arith.constant 17 : index
    %c0_45 = arith.constant 0 : index
    %115 = vector.load %arg7[%c17, %c0_45] : memref<40x64xf32, #tpu.memory_space<vmem>>, vector<1x64xf32>
    %c20 = arith.constant 20 : index
    %c0_46 = arith.constant 0 : index
    %116 = vector.load %arg7[%c20, %c0_46] : memref<40x64xf32, #tpu.memory_space<vmem>>, vector<1x64xf32>
    %cst_47 = arith.constant dense<0.000000e+00> : vector<8xf32>
    %117 = vector.multi_reduction <add>, %114, %cst_47 [1] : vector<8x64xf32> to vector<8xf32>
    %118 = vector.shape_cast %117 : vector<8xf32> to vector<8x1xf32>
    %cst_48 = arith.constant 6.400000e+01 : f32
    %119 = vector.broadcast %cst_48 : f32 to vector<8x1xf32>
    %120 = arith.divf %118, %119 : vector<8x1xf32>
    %121 = vector.broadcast %120 : vector<8x1xf32> to vector<8x64xf32>
    %122 = arith.subf %114, %121 : vector<8x64xf32>
    %123 = arith.mulf %122, %122 : vector<8x64xf32>
    %cst_49 = arith.constant dense<0.000000e+00> : vector<8xf32>
    %124 = vector.multi_reduction <add>, %123, %cst_49 [1] : vector<8x64xf32> to vector<8xf32>
    %125 = vector.shape_cast %124 : vector<8xf32> to vector<8x1xf32>
    %cst_50 = arith.constant 6.400000e+01 : f32
    %126 = vector.broadcast %cst_50 : f32 to vector<8x1xf32>
    %127 = arith.divf %125, %126 : vector<8x1xf32>
    %128 = vector.broadcast %120 : vector<8x1xf32> to vector<8x64xf32>
    %129 = arith.subf %114, %128 : vector<8x64xf32>
    %cst_51 = arith.constant 9.99999974E-6 : f32
    %130 = vector.broadcast %cst_51 : f32 to vector<8x1xf32>
    %131 = arith.addf %127, %130 : vector<8x1xf32>
    %132 = math.rsqrt %131 : vector<8x1xf32>
    %133 = vector.broadcast %132 : vector<8x1xf32> to vector<8x64xf32>
    %134 = arith.mulf %129, %133 : vector<8x64xf32>
    %135 = vector.broadcast %115 : vector<1x64xf32> to vector<8x64xf32>
    %136 = arith.mulf %134, %135 : vector<8x64xf32>
    %137 = vector.broadcast %116 : vector<1x64xf32> to vector<8x64xf32>
    %138 = arith.addf %136, %137 : vector<8x64xf32>
    %c6 = arith.constant 6 : index
    %c0_52 = arith.constant 0 : index
    %c0_53 = arith.constant 0 : index
    %139 = vector.load %arg4[%c6, %c0_52, %c0_53] : memref<10x64x64xbf16, #tpu.memory_space<vmem>>, vector<1x64x64xbf16>
    %140 = vector.shape_cast %139 : vector<1x64x64xbf16> to vector<64x64xbf16>
    %141 = arith.truncf %138 : vector<8x64xf32> to vector<8x64xbf16>
    %cst_54 = arith.constant dense<0.000000e+00> : vector<8x64xf32>
    %142 = tpu.matmul %141, %140, %cst_54 {dimension_numbers = #tpu.dot_dimension_numbers<[1], [0], [0], [1], [0, 0, 1, 1], [], []>} : vector<8x64xbf16>, vector<64x64xbf16>, vector<8x64xf32> -> vector<8x64xf32>
    %c23 = arith.constant 23 : index
    %c0_55 = arith.constant 0 : index
    %143 = vector.load %arg7[%c23, %c0_55] : memref<40x64xf32, #tpu.memory_space<vmem>>, vector<1x64xf32>
    %144 = vector.broadcast %143 : vector<1x64xf32> to vector<8x64xf32>
    %145 = arith.addf %142, %144 : vector<8x64xf32>
    %cst_56 = arith.constant 0.000000e+00 : f32
    %146 = vector.broadcast %cst_56 : f32 to vector<8x64xf32>
    %147 = arith.cmpf oge, %145, %146 : vector<8x64xf32>
    %cst_57 = arith.constant 1.000000e-01 : f32
    %148 = vector.broadcast %cst_57 : f32 to vector<8x64xf32>
    %149 = arith.mulf %148, %145 : vector<8x64xf32>
    %150 = arith.select %147, %145, %149 : vector<8x64xi1>, vector<8x64xf32>
    %c26 = arith.constant 26 : index
    %c0_58 = arith.constant 0 : index
    %151 = vector.load %arg7[%c26, %c0_58] : memref<40x64xf32, #tpu.memory_space<vmem>>, vector<1x64xf32>
    %c29 = arith.constant 29 : index
    %c0_59 = arith.constant 0 : index
    %152 = vector.load %arg7[%c29, %c0_59] : memref<40x64xf32, #tpu.memory_space<vmem>>, vector<1x64xf32>
    %cst_60 = arith.constant dense<0.000000e+00> : vector<8xf32>
    %153 = vector.multi_reduction <add>, %150, %cst_60 [1] : vector<8x64xf32> to vector<8xf32>
    %154 = vector.shape_cast %153 : vector<8xf32> to vector<8x1xf32>
    %cst_61 = arith.constant 6.400000e+01 : f32
    %155 = vector.broadcast %cst_61 : f32 to vector<8x1xf32>
    %156 = arith.divf %154, %155 : vector<8x1xf32>
    %157 = vector.broadcast %156 : vector<8x1xf32> to vector<8x64xf32>
    %158 = arith.subf %150, %157 : vector<8x64xf32>
    %159 = arith.mulf %158, %158 : vector<8x64xf32>
    %cst_62 = arith.constant dense<0.000000e+00> : vector<8xf32>
    %160 = vector.multi_reduction <add>, %159, %cst_62 [1] : vector<8x64xf32> to vector<8xf32>
    %161 = vector.shape_cast %160 : vector<8xf32> to vector<8x1xf32>
    %cst_63 = arith.constant 6.400000e+01 : f32
    %162 = vector.broadcast %cst_63 : f32 to vector<8x1xf32>
    %163 = arith.divf %161, %162 : vector<8x1xf32>
    %164 = vector.broadcast %156 : vector<8x1xf32> to vector<8x64xf32>
    %165 = arith.subf %150, %164 : vector<8x64xf32>
    %cst_64 = arith.constant 9.99999974E-6 : f32
    %166 = vector.broadcast %cst_64 : f32 to vector<8x1xf32>
    %167 = arith.addf %163, %166 : vector<8x1xf32>
    %168 = math.rsqrt %167 : vector<8x1xf32>
    %169 = vector.broadcast %168 : vector<8x1xf32> to vector<8x64xf32>
    %170 = arith.mulf %165, %169 : vector<8x64xf32>
    %171 = vector.broadcast %151 : vector<1x64xf32> to vector<8x64xf32>
    %172 = arith.mulf %170, %171 : vector<8x64xf32>
    %173 = vector.broadcast %152 : vector<1x64xf32> to vector<8x64xf32>
    %174 = arith.addf %172, %173 : vector<8x64xf32>
    %175 = arith.addf %102, %174 : vector<8x64xf32>
    %c1_65 = arith.constant 1 : index
    %c0_66 = arith.constant 0 : index
    %c0_67 = arith.constant 0 : index
    %176 = vector.load %arg4[%c1_65, %c0_66, %c0_67] : memref<10x64x64xbf16, #tpu.memory_space<vmem>>, vector<1x64x64xbf16>
    %177 = vector.shape_cast %176 : vector<1x64x64xbf16> to vector<64x64xbf16>
    %178 = arith.truncf %175 : vector<8x64xf32> to vector<8x64xbf16>
    %cst_68 = arith.constant dense<0.000000e+00> : vector<8x64xf32>
    %179 = tpu.matmul %178, %177, %cst_68 {dimension_numbers = #tpu.dot_dimension_numbers<[1], [0], [0], [1], [0, 0, 1, 1], [], []>} : vector<8x64xbf16>, vector<64x64xbf16>, vector<8x64xf32> -> vector<8x64xf32>
    %c6_69 = arith.constant 6 : index
    %c0_70 = arith.constant 0 : index
    %180 = vector.load %arg7[%c6_69, %c0_70] : memref<40x64xf32, #tpu.memory_space<vmem>>, vector<1x64xf32>
    %181 = vector.broadcast %180 : vector<1x64xf32> to vector<8x64xf32>
    %182 = arith.addf %179, %181 : vector<8x64xf32>
    %cst_71 = arith.constant 0.000000e+00 : f32
    %183 = vector.broadcast %cst_71 : f32 to vector<8x64xf32>
    %184 = arith.cmpf oge, %182, %183 : vector<8x64xf32>
    %cst_72 = arith.constant 1.000000e-01 : f32
    %185 = vector.broadcast %cst_72 : f32 to vector<8x64xf32>
    %186 = arith.mulf %185, %182 : vector<8x64xf32>
    %187 = arith.select %184, %182, %186 : vector<8x64xi1>, vector<8x64xf32>
    %c9 = arith.constant 9 : index
    %c0_73 = arith.constant 0 : index
    %188 = vector.load %arg7[%c9, %c0_73] : memref<40x64xf32, #tpu.memory_space<vmem>>, vector<1x64xf32>
    %c12 = arith.constant 12 : index
    %c0_74 = arith.constant 0 : index
    %189 = vector.load %arg7[%c12, %c0_74] : memref<40x64xf32, #tpu.memory_space<vmem>>, vector<1x64xf32>
    %cst_75 = arith.constant dense<0.000000e+00> : vector<8xf32>
    %190 = vector.multi_reduction <add>, %187, %cst_75 [1] : vector<8x64xf32> to vector<8xf32>
    %191 = vector.shape_cast %190 : vector<8xf32> to vector<8x1xf32>
    %cst_76 = arith.constant 6.400000e+01 : f32
    %192 = vector.broadcast %cst_76 : f32 to vector<8x1xf32>
    %193 = arith.divf %191, %192 : vector<8x1xf32>
    %194 = vector.broadcast %193 : vector<8x1xf32> to vector<8x64xf32>
    %195 = arith.subf %187, %194 : vector<8x64xf32>
    %196 = arith.mulf %195, %195 : vector<8x64xf32>
    %cst_77 = arith.constant dense<0.000000e+00> : vector<8xf32>
    %197 = vector.multi_reduction <add>, %196, %cst_77 [1] : vector<8x64xf32> to vector<8xf32>
    %198 = vector.shape_cast %197 : vector<8xf32> to vector<8x1xf32>
    %cst_78 = arith.constant 6.400000e+01 : f32
    %199 = vector.broadcast %cst_78 : f32 to vector<8x1xf32>
    %200 = arith.divf %198, %199 : vector<8x1xf32>
    %201 = vector.broadcast %193 : vector<8x1xf32> to vector<8x64xf32>
    %202 = arith.subf %187, %201 : vector<8x64xf32>
    %cst_79 = arith.constant 9.99999974E-6 : f32
    %203 = vector.broadcast %cst_79 : f32 to vector<8x1xf32>
    %204 = arith.addf %200, %203 : vector<8x1xf32>
    %205 = math.rsqrt %204 : vector<8x1xf32>
    %206 = vector.broadcast %205 : vector<8x1xf32> to vector<8x64xf32>
    %207 = arith.mulf %202, %206 : vector<8x64xf32>
    %208 = vector.broadcast %188 : vector<1x64xf32> to vector<8x64xf32>
    %209 = arith.mulf %207, %208 : vector<8x64xf32>
    %210 = vector.broadcast %189 : vector<1x64xf32> to vector<8x64xf32>
    %211 = arith.addf %209, %210 : vector<8x64xf32>
    %c4_80 = arith.constant 4 : index
    %c0_81 = arith.constant 0 : index
    %c0_82 = arith.constant 0 : index
    %212 = vector.load %arg4[%c4_80, %c0_81, %c0_82] : memref<10x64x64xbf16, #tpu.memory_space<vmem>>, vector<1x64x64xbf16>
    %213 = vector.shape_cast %212 : vector<1x64x64xbf16> to vector<64x64xbf16>
    %214 = arith.truncf %211 : vector<8x64xf32> to vector<8x64xbf16>
    %cst_83 = arith.constant dense<0.000000e+00> : vector<8x64xf32>
    %215 = tpu.matmul %214, %213, %cst_83 {dimension_numbers = #tpu.dot_dimension_numbers<[1], [0], [0], [1], [0, 0, 1, 1], [], []>} : vector<8x64xbf16>, vector<64x64xbf16>, vector<8x64xf32> -> vector<8x64xf32>
    %c15 = arith.constant 15 : index
    %c0_84 = arith.constant 0 : index
    %216 = vector.load %arg7[%c15, %c0_84] : memref<40x64xf32, #tpu.memory_space<vmem>>, vector<1x64xf32>
    %217 = vector.broadcast %216 : vector<1x64xf32> to vector<8x64xf32>
    %218 = arith.addf %215, %217 : vector<8x64xf32>
    %cst_85 = arith.constant 0.000000e+00 : f32
    %219 = vector.broadcast %cst_85 : f32 to vector<8x64xf32>
    %220 = arith.cmpf oge, %218, %219 : vector<8x64xf32>
    %cst_86 = arith.constant 1.000000e-01 : f32
    %221 = vector.broadcast %cst_86 : f32 to vector<8x64xf32>
    %222 = arith.mulf %221, %218 : vector<8x64xf32>
    %223 = arith.select %220, %218, %222 : vector<8x64xi1>, vector<8x64xf32>
    %c18 = arith.constant 18 : index
    %c0_87 = arith.constant 0 : index
    %224 = vector.load %arg7[%c18, %c0_87] : memref<40x64xf32, #tpu.memory_space<vmem>>, vector<1x64xf32>
    %c21 = arith.constant 21 : index
    %c0_88 = arith.constant 0 : index
    %225 = vector.load %arg7[%c21, %c0_88] : memref<40x64xf32, #tpu.memory_space<vmem>>, vector<1x64xf32>
    %cst_89 = arith.constant dense<0.000000e+00> : vector<8xf32>
    %226 = vector.multi_reduction <add>, %223, %cst_89 [1] : vector<8x64xf32> to vector<8xf32>
    %227 = vector.shape_cast %226 : vector<8xf32> to vector<8x1xf32>
    %cst_90 = arith.constant 6.400000e+01 : f32
    %228 = vector.broadcast %cst_90 : f32 to vector<8x1xf32>
    %229 = arith.divf %227, %228 : vector<8x1xf32>
    %230 = vector.broadcast %229 : vector<8x1xf32> to vector<8x64xf32>
    %231 = arith.subf %223, %230 : vector<8x64xf32>
    %232 = arith.mulf %231, %231 : vector<8x64xf32>
    %cst_91 = arith.constant dense<0.000000e+00> : vector<8xf32>
    %233 = vector.multi_reduction <add>, %232, %cst_91 [1] : vector<8x64xf32> to vector<8xf32>
    %234 = vector.shape_cast %233 : vector<8xf32> to vector<8x1xf32>
    %cst_92 = arith.constant 6.400000e+01 : f32
    %235 = vector.broadcast %cst_92 : f32 to vector<8x1xf32>
    %236 = arith.divf %234, %235 : vector<8x1xf32>
    %237 = vector.broadcast %229 : vector<8x1xf32> to vector<8x64xf32>
    %238 = arith.subf %223, %237 : vector<8x64xf32>
    %cst_93 = arith.constant 9.99999974E-6 : f32
    %239 = vector.broadcast %cst_93 : f32 to vector<8x1xf32>
    %240 = arith.addf %236, %239 : vector<8x1xf32>
    %241 = math.rsqrt %240 : vector<8x1xf32>
    %242 = vector.broadcast %241 : vector<8x1xf32> to vector<8x64xf32>
    %243 = arith.mulf %238, %242 : vector<8x64xf32>
    %244 = vector.broadcast %224 : vector<1x64xf32> to vector<8x64xf32>
    %245 = arith.mulf %243, %244 : vector<8x64xf32>
    %246 = vector.broadcast %225 : vector<1x64xf32> to vector<8x64xf32>
    %247 = arith.addf %245, %246 : vector<8x64xf32>
    %c7 = arith.constant 7 : index
    %c0_94 = arith.constant 0 : index
    %c0_95 = arith.constant 0 : index
    %248 = vector.load %arg4[%c7, %c0_94, %c0_95] : memref<10x64x64xbf16, #tpu.memory_space<vmem>>, vector<1x64x64xbf16>
    %249 = vector.shape_cast %248 : vector<1x64x64xbf16> to vector<64x64xbf16>
    %250 = arith.truncf %247 : vector<8x64xf32> to vector<8x64xbf16>
    %cst_96 = arith.constant dense<0.000000e+00> : vector<8x64xf32>
    %251 = tpu.matmul %250, %249, %cst_96 {dimension_numbers = #tpu.dot_dimension_numbers<[1], [0], [0], [1], [0, 0, 1, 1], [], []>} : vector<8x64xbf16>, vector<64x64xbf16>, vector<8x64xf32> -> vector<8x64xf32>
    %c24 = arith.constant 24 : index
    %c0_97 = arith.constant 0 : index
    %252 = vector.load %arg7[%c24, %c0_97] : memref<40x64xf32, #tpu.memory_space<vmem>>, vector<1x64xf32>
    %253 = vector.broadcast %252 : vector<1x64xf32> to vector<8x64xf32>
    %254 = arith.addf %251, %253 : vector<8x64xf32>
    %cst_98 = arith.constant 0.000000e+00 : f32
    %255 = vector.broadcast %cst_98 : f32 to vector<8x64xf32>
    %256 = arith.cmpf oge, %254, %255 : vector<8x64xf32>
    %cst_99 = arith.constant 1.000000e-01 : f32
    %257 = vector.broadcast %cst_99 : f32 to vector<8x64xf32>
    %258 = arith.mulf %257, %254 : vector<8x64xf32>
    %259 = arith.select %256, %254, %258 : vector<8x64xi1>, vector<8x64xf32>
    %c27 = arith.constant 27 : index
    %c0_100 = arith.constant 0 : index
    %260 = vector.load %arg7[%c27, %c0_100] : memref<40x64xf32, #tpu.memory_space<vmem>>, vector<1x64xf32>
    %c30 = arith.constant 30 : index
    %c0_101 = arith.constant 0 : index
    %261 = vector.load %arg7[%c30, %c0_101] : memref<40x64xf32, #tpu.memory_space<vmem>>, vector<1x64xf32>
    %cst_102 = arith.constant dense<0.000000e+00> : vector<8xf32>
    %262 = vector.multi_reduction <add>, %259, %cst_102 [1] : vector<8x64xf32> to vector<8xf32>
    %263 = vector.shape_cast %262 : vector<8xf32> to vector<8x1xf32>
    %cst_103 = arith.constant 6.400000e+01 : f32
    %264 = vector.broadcast %cst_103 : f32 to vector<8x1xf32>
    %265 = arith.divf %263, %264 : vector<8x1xf32>
    %266 = vector.broadcast %265 : vector<8x1xf32> to vector<8x64xf32>
    %267 = arith.subf %259, %266 : vector<8x64xf32>
    %268 = arith.mulf %267, %267 : vector<8x64xf32>
    %cst_104 = arith.constant dense<0.000000e+00> : vector<8xf32>
    %269 = vector.multi_reduction <add>, %268, %cst_104 [1] : vector<8x64xf32> to vector<8xf32>
    %270 = vector.shape_cast %269 : vector<8xf32> to vector<8x1xf32>
    %cst_105 = arith.constant 6.400000e+01 : f32
    %271 = vector.broadcast %cst_105 : f32 to vector<8x1xf32>
    %272 = arith.divf %270, %271 : vector<8x1xf32>
    %273 = vector.broadcast %265 : vector<8x1xf32> to vector<8x64xf32>
    %274 = arith.subf %259, %273 : vector<8x64xf32>
    %cst_106 = arith.constant 9.99999974E-6 : f32
    %275 = vector.broadcast %cst_106 : f32 to vector<8x1xf32>
    %276 = arith.addf %272, %275 : vector<8x1xf32>
    %277 = math.rsqrt %276 : vector<8x1xf32>
    %278 = vector.broadcast %277 : vector<8x1xf32> to vector<8x64xf32>
    %279 = arith.mulf %274, %278 : vector<8x64xf32>
    %280 = vector.broadcast %260 : vector<1x64xf32> to vector<8x64xf32>
    %281 = arith.mulf %279, %280 : vector<8x64xf32>
    %282 = vector.broadcast %261 : vector<1x64xf32> to vector<8x64xf32>
    %283 = arith.addf %281, %282 : vector<8x64xf32>
    %284 = arith.addf %211, %283 : vector<8x64xf32>
    %c2_107 = arith.constant 2 : index
    %c0_108 = arith.constant 0 : index
    %c0_109 = arith.constant 0 : index
    %285 = vector.load %arg4[%c2_107, %c0_108, %c0_109] : memref<10x64x64xbf16, #tpu.memory_space<vmem>>, vector<1x64x64xbf16>
    %286 = vector.shape_cast %285 : vector<1x64x64xbf16> to vector<64x64xbf16>
    %287 = arith.truncf %284 : vector<8x64xf32> to vector<8x64xbf16>
    %cst_110 = arith.constant dense<0.000000e+00> : vector<8x64xf32>
    %288 = tpu.matmul %287, %286, %cst_110 {dimension_numbers = #tpu.dot_dimension_numbers<[1], [0], [0], [1], [0, 0, 1, 1], [], []>} : vector<8x64xbf16>, vector<64x64xbf16>, vector<8x64xf32> -> vector<8x64xf32>
    %c7_111 = arith.constant 7 : index
    %c0_112 = arith.constant 0 : index
    %289 = vector.load %arg7[%c7_111, %c0_112] : memref<40x64xf32, #tpu.memory_space<vmem>>, vector<1x64xf32>
    %290 = vector.broadcast %289 : vector<1x64xf32> to vector<8x64xf32>
    %291 = arith.addf %288, %290 : vector<8x64xf32>
    %cst_113 = arith.constant 0.000000e+00 : f32
    %292 = vector.broadcast %cst_113 : f32 to vector<8x64xf32>
    %293 = arith.cmpf oge, %291, %292 : vector<8x64xf32>
    %cst_114 = arith.constant 1.000000e-01 : f32
    %294 = vector.broadcast %cst_114 : f32 to vector<8x64xf32>
    %295 = arith.mulf %294, %291 : vector<8x64xf32>
    %296 = arith.select %293, %291, %295 : vector<8x64xi1>, vector<8x64xf32>
    %c10 = arith.constant 10 : index
    %c0_115 = arith.constant 0 : index
    %297 = vector.load %arg7[%c10, %c0_115] : memref<40x64xf32, #tpu.memory_space<vmem>>, vector<1x64xf32>
    %c13 = arith.constant 13 : index
    %c0_116 = arith.constant 0 : index
    %298 = vector.load %arg7[%c13, %c0_116] : memref<40x64xf32, #tpu.memory_space<vmem>>, vector<1x64xf32>
    %cst_117 = arith.constant dense<0.000000e+00> : vector<8xf32>
    %299 = vector.multi_reduction <add>, %296, %cst_117 [1] : vector<8x64xf32> to vector<8xf32>
    %300 = vector.shape_cast %299 : vector<8xf32> to vector<8x1xf32>
    %cst_118 = arith.constant 6.400000e+01 : f32
    %301 = vector.broadcast %cst_118 : f32 to vector<8x1xf32>
    %302 = arith.divf %300, %301 : vector<8x1xf32>
    %303 = vector.broadcast %302 : vector<8x1xf32> to vector<8x64xf32>
    %304 = arith.subf %296, %303 : vector<8x64xf32>
    %305 = arith.mulf %304, %304 : vector<8x64xf32>
    %cst_119 = arith.constant dense<0.000000e+00> : vector<8xf32>
    %306 = vector.multi_reduction <add>, %305, %cst_119 [1] : vector<8x64xf32> to vector<8xf32>
    %307 = vector.shape_cast %306 : vector<8xf32> to vector<8x1xf32>
    %cst_120 = arith.constant 6.400000e+01 : f32
    %308 = vector.broadcast %cst_120 : f32 to vector<8x1xf32>
    %309 = arith.divf %307, %308 : vector<8x1xf32>
    %310 = vector.broadcast %302 : vector<8x1xf32> to vector<8x64xf32>
    %311 = arith.subf %296, %310 : vector<8x64xf32>
    %cst_121 = arith.constant 9.99999974E-6 : f32
    %312 = vector.broadcast %cst_121 : f32 to vector<8x1xf32>
    %313 = arith.addf %309, %312 : vector<8x1xf32>
    %314 = math.rsqrt %313 : vector<8x1xf32>
    %315 = vector.broadcast %314 : vector<8x1xf32> to vector<8x64xf32>
    %316 = arith.mulf %311, %315 : vector<8x64xf32>
    %317 = vector.broadcast %297 : vector<1x64xf32> to vector<8x64xf32>
    %318 = arith.mulf %316, %317 : vector<8x64xf32>
    %319 = vector.broadcast %298 : vector<1x64xf32> to vector<8x64xf32>
    %320 = arith.addf %318, %319 : vector<8x64xf32>
    %c5_122 = arith.constant 5 : index
    %c0_123 = arith.constant 0 : index
    %c0_124 = arith.constant 0 : index
    %321 = vector.load %arg4[%c5_122, %c0_123, %c0_124] : memref<10x64x64xbf16, #tpu.memory_space<vmem>>, vector<1x64x64xbf16>
    %322 = vector.shape_cast %321 : vector<1x64x64xbf16> to vector<64x64xbf16>
    %323 = arith.truncf %320 : vector<8x64xf32> to vector<8x64xbf16>
    %cst_125 = arith.constant dense<0.000000e+00> : vector<8x64xf32>
    %324 = tpu.matmul %323, %322, %cst_125 {dimension_numbers = #tpu.dot_dimension_numbers<[1], [0], [0], [1], [0, 0, 1, 1], [], []>} : vector<8x64xbf16>, vector<64x64xbf16>, vector<8x64xf32> -> vector<8x64xf32>
    %c16 = arith.constant 16 : index
    %c0_126 = arith.constant 0 : index
    %325 = vector.load %arg7[%c16, %c0_126] : memref<40x64xf32, #tpu.memory_space<vmem>>, vector<1x64xf32>
    %326 = vector.broadcast %325 : vector<1x64xf32> to vector<8x64xf32>
    %327 = arith.addf %324, %326 : vector<8x64xf32>
    %cst_127 = arith.constant 0.000000e+00 : f32
    %328 = vector.broadcast %cst_127 : f32 to vector<8x64xf32>
    %329 = arith.cmpf oge, %327, %328 : vector<8x64xf32>
    %cst_128 = arith.constant 1.000000e-01 : f32
    %330 = vector.broadcast %cst_128 : f32 to vector<8x64xf32>
    %331 = arith.mulf %330, %327 : vector<8x64xf32>
    %332 = arith.select %329, %327, %331 : vector<8x64xi1>, vector<8x64xf32>
    %c19 = arith.constant 19 : index
    %c0_129 = arith.constant 0 : index
    %333 = vector.load %arg7[%c19, %c0_129] : memref<40x64xf32, #tpu.memory_space<vmem>>, vector<1x64xf32>
    %c22 = arith.constant 22 : index
    %c0_130 = arith.constant 0 : index
    %334 = vector.load %arg7[%c22, %c0_130] : memref<40x64xf32, #tpu.memory_space<vmem>>, vector<1x64xf32>
    %cst_131 = arith.constant dense<0.000000e+00> : vector<8xf32>
    %335 = vector.multi_reduction <add>, %332, %cst_131 [1] : vector<8x64xf32> to vector<8xf32>
    %336 = vector.shape_cast %335 : vector<8xf32> to vector<8x1xf32>
    %cst_132 = arith.constant 6.400000e+01 : f32
    %337 = vector.broadcast %cst_132 : f32 to vector<8x1xf32>
    %338 = arith.divf %336, %337 : vector<8x1xf32>
    %339 = vector.broadcast %338 : vector<8x1xf32> to vector<8x64xf32>
    %340 = arith.subf %332, %339 : vector<8x64xf32>
    %341 = arith.mulf %340, %340 : vector<8x64xf32>
    %cst_133 = arith.constant dense<0.000000e+00> : vector<8xf32>
    %342 = vector.multi_reduction <add>, %341, %cst_133 [1] : vector<8x64xf32> to vector<8xf32>
    %343 = vector.shape_cast %342 : vector<8xf32> to vector<8x1xf32>
    %cst_134 = arith.constant 6.400000e+01 : f32
    %344 = vector.broadcast %cst_134 : f32 to vector<8x1xf32>
    %345 = arith.divf %343, %344 : vector<8x1xf32>
    %346 = vector.broadcast %338 : vector<8x1xf32> to vector<8x64xf32>
    %347 = arith.subf %332, %346 : vector<8x64xf32>
    %cst_135 = arith.constant 9.99999974E-6 : f32
    %348 = vector.broadcast %cst_135 : f32 to vector<8x1xf32>
    %349 = arith.addf %345, %348 : vector<8x1xf32>
    %350 = math.rsqrt %349 : vector<8x1xf32>
    %351 = vector.broadcast %350 : vector<8x1xf32> to vector<8x64xf32>
    %352 = arith.mulf %347, %351 : vector<8x64xf32>
    %353 = vector.broadcast %333 : vector<1x64xf32> to vector<8x64xf32>
    %354 = arith.mulf %352, %353 : vector<8x64xf32>
    %355 = vector.broadcast %334 : vector<1x64xf32> to vector<8x64xf32>
    %356 = arith.addf %354, %355 : vector<8x64xf32>
    %c8_136 = arith.constant 8 : index
    %c0_137 = arith.constant 0 : index
    %c0_138 = arith.constant 0 : index
    %357 = vector.load %arg4[%c8_136, %c0_137, %c0_138] : memref<10x64x64xbf16, #tpu.memory_space<vmem>>, vector<1x64x64xbf16>
    %358 = vector.shape_cast %357 : vector<1x64x64xbf16> to vector<64x64xbf16>
    %359 = arith.truncf %356 : vector<8x64xf32> to vector<8x64xbf16>
    %cst_139 = arith.constant dense<0.000000e+00> : vector<8x64xf32>
    %360 = tpu.matmul %359, %358, %cst_139 {dimension_numbers = #tpu.dot_dimension_numbers<[1], [0], [0], [1], [0, 0, 1, 1], [], []>} : vector<8x64xbf16>, vector<64x64xbf16>, vector<8x64xf32> -> vector<8x64xf32>
    %c25 = arith.constant 25 : index
    %c0_140 = arith.constant 0 : index
    %361 = vector.load %arg7[%c25, %c0_140] : memref<40x64xf32, #tpu.memory_space<vmem>>, vector<1x64xf32>
    %362 = vector.broadcast %361 : vector<1x64xf32> to vector<8x64xf32>
    %363 = arith.addf %360, %362 : vector<8x64xf32>
    %cst_141 = arith.constant 0.000000e+00 : f32
    %364 = vector.broadcast %cst_141 : f32 to vector<8x64xf32>
    %365 = arith.cmpf oge, %363, %364 : vector<8x64xf32>
    %cst_142 = arith.constant 1.000000e-01 : f32
    %366 = vector.broadcast %cst_142 : f32 to vector<8x64xf32>
    %367 = arith.mulf %366, %363 : vector<8x64xf32>
    %368 = arith.select %365, %363, %367 : vector<8x64xi1>, vector<8x64xf32>
    %c28 = arith.constant 28 : index
    %c0_143 = arith.constant 0 : index
    %369 = vector.load %arg7[%c28, %c0_143] : memref<40x64xf32, #tpu.memory_space<vmem>>, vector<1x64xf32>
    %c31 = arith.constant 31 : index
    %c0_144 = arith.constant 0 : index
    %370 = vector.load %arg7[%c31, %c0_144] : memref<40x64xf32, #tpu.memory_space<vmem>>, vector<1x64xf32>
    %cst_145 = arith.constant dense<0.000000e+00> : vector<8xf32>
    %371 = vector.multi_reduction <add>, %368, %cst_145 [1] : vector<8x64xf32> to vector<8xf32>
    %372 = vector.shape_cast %371 : vector<8xf32> to vector<8x1xf32>
    %cst_146 = arith.constant 6.400000e+01 : f32
    %373 = vector.broadcast %cst_146 : f32 to vector<8x1xf32>
    %374 = arith.divf %372, %373 : vector<8x1xf32>
    %375 = vector.broadcast %374 : vector<8x1xf32> to vector<8x64xf32>
    %376 = arith.subf %368, %375 : vector<8x64xf32>
    %377 = arith.mulf %376, %376 : vector<8x64xf32>
    %cst_147 = arith.constant dense<0.000000e+00> : vector<8xf32>
    %378 = vector.multi_reduction <add>, %377, %cst_147 [1] : vector<8x64xf32> to vector<8xf32>
    %379 = vector.shape_cast %378 : vector<8xf32> to vector<8x1xf32>
    %cst_148 = arith.constant 6.400000e+01 : f32
    %380 = vector.broadcast %cst_148 : f32 to vector<8x1xf32>
    %381 = arith.divf %379, %380 : vector<8x1xf32>
    %382 = vector.broadcast %374 : vector<8x1xf32> to vector<8x64xf32>
    %383 = arith.subf %368, %382 : vector<8x64xf32>
    %cst_149 = arith.constant 9.99999974E-6 : f32
    %384 = vector.broadcast %cst_149 : f32 to vector<8x1xf32>
    %385 = arith.addf %381, %384 : vector<8x1xf32>
    %386 = math.rsqrt %385 : vector<8x1xf32>
    %387 = vector.broadcast %386 : vector<8x1xf32> to vector<8x64xf32>
    %388 = arith.mulf %383, %387 : vector<8x64xf32>
    %389 = vector.broadcast %369 : vector<1x64xf32> to vector<8x64xf32>
    %390 = arith.mulf %388, %389 : vector<8x64xf32>
    %391 = vector.broadcast %370 : vector<1x64xf32> to vector<8x64xf32>
    %392 = arith.addf %390, %391 : vector<8x64xf32>
    %393 = arith.addf %320, %392 : vector<8x64xf32>
    %c9_150 = arith.constant 9 : index
    %c0_151 = arith.constant 0 : index
    %c0_152 = arith.constant 0 : index
    %394 = vector.load %arg4[%c9_150, %c0_151, %c0_152] : memref<10x64x64xbf16, #tpu.memory_space<vmem>>, vector<1x64x64xbf16>
    %395 = vector.shape_cast %394 : vector<1x64x64xbf16> to vector<64x64xbf16>
    %396 = arith.truncf %393 : vector<8x64xf32> to vector<8x64xbf16>
    %cst_153 = arith.constant dense<0.000000e+00> : vector<8x64xf32>
    %397 = tpu.matmul %396, %395, %cst_153 {dimension_numbers = #tpu.dot_dimension_numbers<[1], [0], [0], [1], [0, 0, 1, 1], [], []>} : vector<8x64xbf16>, vector<64x64xbf16>, vector<8x64xf32> -> vector<8x64xf32>
    %c32 = arith.constant 32 : index
    %c0_154 = arith.constant 0 : index
    %398 = vector.load %arg7[%c32, %c0_154] : memref<40x64xf32, #tpu.memory_space<vmem>>, vector<1x64xf32>
    %399 = vector.broadcast %398 : vector<1x64xf32> to vector<8x64xf32>
    %400 = arith.addf %397, %399 : vector<8x64xf32>
    %cst_155 = arith.constant 0.000000e+00 : f32
    %401 = vector.broadcast %cst_155 : f32 to vector<8x64xf32>
    %402 = arith.maximumf %400, %401 : vector<8x64xf32>
    %c0_156 = arith.constant 0 : index
    %c0_157 = arith.constant 0 : index
    %403 = vector.load %arg5[%c0_156, %c0_157] : memref<64x32xbf16, #tpu.memory_space<vmem>>, vector<64x32xbf16>
    %404 = arith.truncf %402 : vector<8x64xf32> to vector<8x64xbf16>
    %cst_158 = arith.constant dense<0.000000e+00> : vector<8x32xf32>
    %405 = tpu.matmul %404, %403, %cst_158 {dimension_numbers = #tpu.dot_dimension_numbers<[1], [0], [0], [1], [0, 0, 1, 1], [], []>} : vector<8x64xbf16>, vector<64x32xbf16>, vector<8x32xf32> -> vector<8x32xf32>
    %c33 = arith.constant 33 : index
    %c0_159 = arith.constant 0 : index
    %406 = vector.load %arg7[%c33, %c0_159] : memref<40x64xf32, #tpu.memory_space<vmem>>, vector<1x64xf32>
    %407 = vector.extract_strided_slice %406 {offsets = [0, 0], sizes = [1, 32], strides = [1, 1]} : vector<1x64xf32> to vector<1x32xf32>
    %408 = vector.broadcast %407 : vector<1x32xf32> to vector<8x32xf32>
    %409 = arith.addf %405, %408 : vector<8x32xf32>
    %cst_160 = arith.constant 0.000000e+00 : f32
    %410 = vector.broadcast %cst_160 : f32 to vector<8x32xf32>
    %411 = arith.maximumf %409, %410 : vector<8x32xf32>
    %c0_161 = arith.constant 0 : index
    %c0_162 = arith.constant 0 : index
    %412 = vector.load %arg6[%c0_161, %c0_162] : memref<32x8xbf16, #tpu.memory_space<vmem>>, vector<32x8xbf16>
    %413 = arith.truncf %411 : vector<8x32xf32> to vector<8x32xbf16>
    %cst_163 = arith.constant dense<0.000000e+00> : vector<8x8xf32>
    %414 = tpu.matmul %413, %412, %cst_163 {dimension_numbers = #tpu.dot_dimension_numbers<[1], [0], [0], [1], [0, 0, 1, 1], [], []>} : vector<8x32xbf16>, vector<32x8xbf16>, vector<8x8xf32> -> vector<8x8xf32>
    %c34 = arith.constant 34 : index
    %c0_164 = arith.constant 0 : index
    %415 = vector.load %arg7[%c34, %c0_164] : memref<40x64xf32, #tpu.memory_space<vmem>>, vector<1x64xf32>
    %416 = vector.extract_strided_slice %415 {offsets = [0, 0], sizes = [1, 8], strides = [1, 1]} : vector<1x64xf32> to vector<1x8xf32>
    %417 = vector.broadcast %416 : vector<1x8xf32> to vector<8x8xf32>
    %418 = arith.addf %414, %417 : vector<8x8xf32>
    %c0_165 = arith.constant 0 : index
    %c0_166 = arith.constant 0 : index
    %419 = vector.load %arg8[%c0_165, %c0_166] : memref<8x8xf32, #tpu.memory_space<vmem>>, vector<8x8xf32>
    tpu.vector_store %arg8[%c0_165, %c0_166], %418 {strides = array<i32>} : memref<8x8xf32, #tpu.memory_space<vmem>>, vector<8x8xf32>,
    return
  }
  func.func @transform_0(%arg0: i32) -> (i32, i32) {
    %c0_i32 = arith.constant 0 : i32
    %c0_i32_0 = arith.constant 0 : i32
    return %arg0, %c0_i32 : i32, i32
  }
  func.func @transform_1(%arg0: i32) -> (i32, i32) {
    %c0_i32 = arith.constant 0 : i32
    %c0_i32_0 = arith.constant 0 : i32
    %c0_i32_1 = arith.constant 0 : i32
    return %c0_i32, %c0_i32_0 : i32, i32
  }
  func.func @transform_2(%arg0: i32) -> (i32, i32) {
    %c0_i32 = arith.constant 0 : i32
    %c0_i32_0 = arith.constant 0 : i32
    %c0_i32_1 = arith.constant 0 : i32
    return %c0_i32, %c0_i32_0 : i32, i32
  }
  func.func @transform_3(%arg0: i32) -> (i32, i32, i32) {
    %c0_i32 = arith.constant 0 : i32
    %c0_i32_0 = arith.constant 0 : i32
    %c0_i32_1 = arith.constant 0 : i32
    %c0_i32_2 = arith.constant 0 : i32
    return %c0_i32, %c0_i32_0, %c0_i32_1 : i32, i32, i32
  }
  func.func @transform_4(%arg0: i32) -> (i32, i32) {
    %c0_i32 = arith.constant 0 : i32
    %c0_i32_0 = arith.constant 0 : i32
    %c0_i32_1 = arith.constant 0 : i32
    return %c0_i32, %c0_i32_0 : i32, i32
  }
  func.func @transform_5(%arg0: i32) -> (i32, i32) {
    %c0_i32 = arith.constant 0 : i32
    %c0_i32_0 = arith.constant 0 : i32
    %c0_i32_1 = arith.constant 0 : i32
    return %c0_i32, %c0_i32_0 : i32, i32
  }
  func.func @transform_6(%arg0: i32) -> (i32, i32) {
    %c0_i32 = arith.constant 0 : i32
    %c0_i32_0 = arith.constant 0 : i32
    %c0_i32_1 = arith.constant 0 : i32
    return %c0_i32, %c0_i32_0 : i32, i32
  }
  func.func @transform_7(%arg0: i32) -> (i32, i32) {
    %c0_i32 = arith.constant 0 : i32
    %c0_i32_0 = arith.constant 0 : i32
    return %arg0, %c0_i32 : i32, i32
  }
}

</mosaic_0001>

<bundles_post_ra>
// kernel: advanced_feedforward.1
= control target key start
LH: loop header
LB: loop body
LE: loop exit
PB: predicated region body
PF: predicated region fallthrough
CT: control target
= control target key end

     0   :  { %12 = vsyncpa [#allocation3], 0  ;;  %s2214_s0 = inlined_call_operand.vmem [shape: f32[8,16], index: 0, kind: input, shape index: {}]   ;;  %s2215_s1 = inlined_call_operand.vmem [shape: bf16[16,64], index: 1, kind: input, shape index: {}]   ;;  %s2216_s2 = inlined_call_operand.vmem [shape: bf16[16,64], index: 2, kind: input, shape index: {}]   ;;  %s2217_s3 = inlined_call_operand.hbm [shape: bf16[10,64,64], index: 3, kind: input, shape index: {}]   ;;  %s2218_s4 = inlined_call_operand.vmem [shape: bf16[64,32], index: 4, kind: input, shape index: {}]   ;;  %s2219_s5 = inlined_call_operand.vmem [shape: bf16[32,8], index: 5, kind: input, shape index: {}]   ;;  %s2220_s6 = inlined_call_operand.vmem [shape: f32[40,64], index: 6, kind: input, shape index: {}]   ;;  %s2221_s7 = inlined_call_operand.hbm [shape: f32[8,8], index: 7, kind: output, shape index: {}]  }
   0x1   :  { %13 = vsyncpa [#allocation4], 0  ;;  %s1886_s24 = smov [#allocation2]   ;;  %s1838_s28 = scalar_lea.hbm %s2217_s3, 5120 }
   0x2   :  { %s25_s25 = sshll.u32 %s1886_s24, 4  ;;  %p1839_p0 = scmp.ne.s32.totalorder %s2217_s3, %s1838_s28  ;;  %s26_s25 = int_to_ptr.vmem [resolvable:$true] %s25_s25 }
   0x3   :  { %p1842_p1 = scmp.lt.u32.totalorder %s1838_s28, %s2217_s3 }
   0x5   :  { %p1844_p2 = pnand %p1842_p1, %p1839_p0 }
   0x7   :  { %1847 = shalt.err (!%p1844_p2)
}
   0x8   :  { %s1848_s10 = scalar_lea.vmem %s26_s25, 5120  ;;  %p1853_p4 = scmp.lt.s32.totalorder %s26_s25, %s26_s25 }
   0x9   :  { %p1849_p3 = scmp.ne.s32.totalorder %s26_s25, %s1848_s10  ;;  %p1854_p5 = scmp.lt.s32.totalorder %s1848_s10, %s1848_s10 }
   0xb   :  { %p1855_p6 = por %p1854_p5, %p1853_p4 }
   0xd   :  { %p1856_p7 = pnand %p1855_p6, %p1849_p3 }
   0xf   :  { %1859 = shalt.err (!%p1856_p7)
}
  0x10   :  { %s1887_s11 = smov 64   ;;  %s1888_s12 = smov 4  }
  0x11   :  { %31 = dma.hbm_to_vmem [thread:$0]  %s2217_s3, 5120, %s26_s25, [#allocation3], %s1887_s11, %s1887_s11, %s1888_s12  }
  0x12   :  { %1882 = dma.done.wait [#allocation3], 5120  }
  0x13   :  { %1883 = vsyncadd [#allocation3], 4294962176  ;;  %vm45_vm0 = vcmask 130048   ;;  %v42_v0 = vld [vmem:[%s2214_s0] sm:$0xff]  ;;  %v1889_v9 = vmov 0.0   ;;  %vm1890_vm1 = vmmov 0  }
  0x14   :  { %v46_v1 = vsel %vm45_vm0, %v42_v0, 0.0  ;;  %v1768_v7 = vld [vmem:[%s2215_s1] sm:$0xff]   ;;  %1616 = vmatprep.subr.bf16.mxu1 %v1889_v9  ;;  %1610 = vmatprep.subr.bf16.mxu0 %v1889_v9  ;;  %vm186_vm3 = vcmask 523264   ;;  %v1771_v42 = vld [vmem:[#allocation2 + $0x8] sm:$0xff]   ;;  %v1772_v43 = vld [vmem:[#allocation2 + $0x10] sm:$0xff]   ;;  %vm1390_vm13 = vcmask 261120  }
  0x15   :  { %47 = vadd.xlane.f32.xlu0 %v46_v1  ;;  %v1769_v8 = vld [vmem:[%s2216_s2] sm:$0xff]   ;;  %1617 = vmatpush3.bf16.msra.mxu1 %v1768_v7  ;;  %v1773_v44 = vld [vmem:[#allocation2 + $0x18] sm:$0xff]   ;;  %v1776_v7 = vld [vmem:[#allocation2 + $0x70] sm:$0xff]   ;;  %s1891_s0 = smov [#allocation5]   ;;  %vm1434_vm14 = vcmask 64512  }
  0x16   :  { %1611 = vmatpush3.bf16.msra.mxu0 %v1769_v8  ;;  %1618 = vmatprep.mubr.msk.bf16.mxu1 %vm1890_vm1, %v1889_v9  ;;  %v1451_v14 = vld [vmem:[%s2220_s6] ss:$0 sm:$0xff]  ;;  %v1452_v16 = vld [vmem:[%s2220_s6 + $0x1] ss:$0 sm:$0xff]  ;;  %v1457_v25 = vld [vmem:[%s2220_s6 + $0x2] ss:$0 sm:$0xff] }
  0x17   :  { %1612 = vmatprep.mubr.msk.bf16.mxu0 %vm1890_vm1, %v1889_v9  ;;  %1622 = vmatprep.subr.bf16.mxu0 %v1889_v9  ;;  %v1770_v41 = vld [vmem:[#allocation2] sm:$0xff]   ;;  %v1777_v8 = vld [vmem:[#allocation2 + $0x78] sm:$0xff]  }
  0x18   :  { %1634 = vmatprep.subr.bf16.mxu1 %v1889_v9  ;;  %v1458_v49 = vld [vmem:[%s2220_s6 + $0x3] ss:$0 sm:$0xff]  ;;  %v1459_v51 = vld [vmem:[%s2220_s6 + $0x4] ss:$0 sm:$0xff]  ;;  %v1460_v55 = vld [vmem:[%s2220_s6 + $0x5] ss:$0 sm:$0xff] }
  0xa2   :  { %v48_v2 = vpop.xlane.xlu0 %47 }
  0xa3   :  { %v50_v3 = vmul.f32 0.0625, %v48_v2 }
  0xa5   :  { %v51_v4 = vsub.f32 %v42_v0, %v50_v3 }
  0xa7   :  { %v52_v5 = vmul.f32 %v51_v4, %v51_v4 }
  0xa9   :  { %v53_v6 = vsel %vm45_vm0, %v52_v5, 0.0  ;;  %v1774_v5 = vld [vmem:[#allocation2 + $0x60] sm:$0xff]  }
  0xaa   :  { %54 = vadd.xlane.f32.xlu0 %v53_v6  ;;  %v1775_v6 = vld [vmem:[#allocation2 + $0x68] sm:$0xff]  }
 0x137   :  { %v55_v10 = vpop.xlane.xlu0 %54 }
 0x138   :  { %v56_v11 = vmul.f32 0.0625, %v55_v10 }
 0x13a   :  { %v57_v12 = vadd.f32 1e-05, %v56_v11 }
 0x13c   :  { %1816 = vrsqrt.f32 %v57_v12 }
 0x146   :  { %v1817_v13 = vpop.eup %1816 }
 0x147   :  { %v59_v15 = vmul.f32 %v1817_v13, %v51_v4 }
 0x149   :  { %v64_v17 = vmul.f32 %v1451_v14, %v59_v15  ;;  %v1466_v14 = vld [vmem:[%s2220_s6 + $0x8] ss:$0 sm:$0xff] }
 0x14b   :  { %v69_v18 = vadd.f32 %v1452_v16, %v64_v17  ;;  %v1467_v16 = vld [vmem:[%s2220_s6 + $0xb] ss:$0 sm:$0xff] }
 0x14d   :  { %v72_v19 = vpack.c.bf16 %v69_v18, %v69_v18  ;;  %v73_v20 = vmul.f32 %v69_v18, %v69_v18 }
 0x14f   :  { %1619 = vmatmul.mubr.msk.bf16.vlgmr.msra.gmra.mrb[0].mxu1 %vm45_vm0, %v72_v19  ;;  %v76_v21 = vpack.c.bf16 %v73_v20, %v73_v20  ;;  %v1468_v20 = vld [vmem:[%s2220_s6 + $0xe] ss:$0 sm:$0xff] }
 0x150   :  { %1642 = vmatprep.mubr.msk.bf16.mxu1 %vm1890_vm1, %v1889_v9  ;;  %1635 = vmatpush3.bf16.msra.mxu1 %v1774_v5 }
 0x151   :  { %1613 = vmatmul.mubr.msk.bf16.vlgmr.msra.gmra.mrb[0].mxu0 %vm45_vm0, %v76_v21  ;;  %1636 = vmatprep.subr.bf16.mxu1 %v1889_v9 }
 0x152   :  { %1630 = vmatprep.mubr.msk.bf16.mxu0 %vm1890_vm1, %v1889_v9  ;;  %1623 = vmatpush3.bf16.msra.mxu0 %v1770_v41 }
 0x153   :  { %1624 = vmatprep.subr.bf16.mxu0 %v1889_v9 }
 0x154   :  { %1637 = vmatpush3.bf16.msra.mxu1 %v1775_v6  ;;  %v1482_v6 = vld [vmem:[%s2220_s6 + $0x1a] ss:$0 sm:$0xff] }
 0x155   :  { %1638 = vmatprep.subr.bf16.mxu1 %v1889_v9 }
 0x156   :  { %1625 = vmatpush3.bf16.msra.mxu0 %v1771_v42  ;;  %v1474_v42 = vld [vmem:[%s2220_s6 + $0x11] ss:$0 sm:$0xff] }
 0x157   :  { %1626 = vmatprep.subr.bf16.mxu0 %v1889_v9 }
 0x158   :  { %1639 = vmatpush3.bf16.msra.mxu1 %v1776_v7 }
 0x159   :  { %1640 = vmatprep.subr.bf16.mxu1 %v1889_v9 }
 0x15a   :  { %1627 = vmatpush3.bf16.msra.mxu0 %v1772_v43 }
 0x15b   :  { %1628 = vmatprep.subr.bf16.mxu0 %v1889_v9 }
 0x15c   :  { %1641 = vmatpush3.bf16.msra.mxu1 %v1777_v8  ;;  %v1483_v8 = vld [vmem:[%s2220_s6 + $0x1d] ss:$0 sm:$0xff] }
 0x15d   :  { %1658 = vmatprep.subr.bf16.mxu1 %v1889_v9 }
 0x15e   :  { %1629 = vmatpush3.bf16.msra.mxu0 %v1773_v44  ;;  %v1475_v44 = vld [vmem:[%s2220_s6 + $0x14] ss:$0 sm:$0xff] }
 0x15f   :  { %1646 = vmatprep.subr.bf16.mxu0 %v1889_v9 }
 0x222   :  { %v169_v22 = vpop.f32.mrb[0].mxu1 }
 0x223   :  { %v1620_v23 = vpop.f32.mrb[1].mxu1 }
 0x224   :  { %v120_v24 = vpop.f32.mrb[0].mxu0  ;;  %v172_v26 = vpop.f32.mrb[2].mxu1 }
 0x225   :  { %v170_v27 = vadd.f32 %v169_v22, %v120_v24  ;;  %v1614_v28 = vpop.f32.mrb[1].mxu0  ;;  %v1621_v29 = vpop.f32.mrb[3].mxu1 }
 0x226   :  { %v123_v30 = vpop.f32.mrb[2].mxu0 }
 0x227   :  { %v180_v31 = vadd.f32 %v1457_v25, %v170_v27  ;;  %v1615_v32 = vpop.f32.mrb[3].mxu0 }
 0x229   :  { %vm181_vm2 = vcmp.ge.f32.partialorder %v180_v31, 0.0  ;;  %v182_v33 = vmul.f32 0.1, %v180_v31 }
 0x22b   :  { %v183_v34 = vsel %vm181_vm2, %v180_v31, %v182_v33 }
 0x22c   :  { %v187_v35 = vsel %vm186_vm3, %v183_v34, 0.0 }
 0x22d   :  { %188 = vadd.xlane.f32.xlu1 %v187_v35  ;;  %v1779_v35 = vld [vmem:[#allocation2 + $0xc8] sm:$0xff]  }
 0x2ba   :  { %v189_v36 = vpop.xlane.xlu1 %188 }
 0x2bb   :  { %v191_v37 = vmul.f32 0.015625, %v189_v36  ;;  %v1780_v36 = vld [vmem:[#allocation2 + $0xd0] sm:$0xff]  }
 0x2bd   :  { %v192_v38 = vsub.f32 %v183_v34, %v191_v37  ;;  %v1778_v34 = vld [vmem:[#allocation2 + $0xc0] sm:$0xff]   ;;  %v1781_v37 = vld [vmem:[#allocation2 + $0xd8] sm:$0xff]  }
 0x2bf   :  { %v193_v39 = vmul.f32 %v192_v38, %v192_v38 }
 0x2c1   :  { %v194_v40 = vsel %vm186_vm3, %v193_v39, 0.0 }
 0x2c2   :  { %195 = vadd.xlane.f32.xlu1 %v194_v40 }
 0x34f   :  { %v196_v45 = vpop.xlane.xlu1 %195 }
 0x350   :  { %v197_v46 = vmul.f32 0.015625, %v196_v45 }
 0x352   :  { %v198_v47 = vadd.f32 1e-05, %v197_v46 }
 0x354   :  { %1818 = vrsqrt.f32 %v198_v47 }
 0x35e   :  { %v1819_v48 = vpop.eup %1818 }
 0x35f   :  { %v200_v50 = vmul.f32 %v1819_v48, %v192_v38  ;;  %v1476_v48 = vld [vmem:[%s2220_s6 + $0x17] ss:$0 sm:$0xff] }
 0x361   :  { %v205_v52 = vmul.f32 %v1458_v49, %v200_v50 }
 0x363   :  { %v210_v53 = vadd.f32 %v1459_v51, %v205_v52 }
 0x365   :  { %v219_v54 = vpack.c.bf16 %v210_v53, %v210_v53 }
 0x367   :  { %1631 = vmatmul.mubr.msk.bf16.vlgmr.msra.gmra.mrb[4].mxu0 %vm186_vm3, %v219_v54 }
 0x368   :  { %1654 = vmatprep.mubr.msk.bf16.mxu0 %vm1890_vm1, %v1889_v9  ;;  %1647 = vmatpush3.bf16.msra.mxu0 %v1778_v34 }
 0x369   :  { %1648 = vmatprep.subr.bf16.mxu0 %v1889_v9 }
 0x36c   :  { %1649 = vmatpush3.bf16.msra.mxu0 %v1779_v35 }
 0x36d   :  { %1650 = vmatprep.subr.bf16.mxu0 %v1889_v9 }
 0x370   :  { %1651 = vmatpush3.bf16.msra.mxu0 %v1780_v36  ;;  %v1490_v36 = vld [vmem:[%s2220_s6 + $0x9] ss:$0 sm:$0xff] }
 0x371   :  { %1652 = vmatprep.subr.bf16.mxu0 %v1889_v9 }
 0x374   :  { %1653 = vmatpush3.bf16.msra.mxu0 %v1781_v37 }
 0x375   :  { %1670 = vmatprep.subr.bf16.mxu0 %v1889_v9 }
 0x43a   :  { %v286_v56 = vpop.f32.mrb[4].mxu0 }
 0x43b   :  { %v287_v57 = vadd.f32 %v1460_v55, %v286_v56  ;;  %v1632_v58 = vpop.f32.mrb[5].mxu0 }
 0x43c   :  { %v289_v59 = vpop.f32.mrb[6].mxu0 }
 0x43d   :  { %v293_v60 = vmul.f32 0.1, %v287_v57  ;;  %v1633_v61 = vpop.f32.mrb[7].mxu0  ;;  %vm292_vm4 = vcmp.ge.f32.partialorder %v287_v57, 0.0 }
 0x43f   :  { %v294_v62 = vsel %vm292_vm4, %v287_v57, %v293_v60 }
 0x440   :  { %v297_v63 = vsel %vm186_vm3, %v294_v62, 0.0 }
 0x441   :  { %298 = vadd.xlane.f32.xlu0 %v297_v63  ;;  %v1783_v63 = vld [vmem:[#allocation2 + $0x28] sm:$0xff]  }
 0x4ce   :  { %v299_v0 = vpop.xlane.xlu0 %298 }
 0x4cf   :  { %v300_v1 = vmul.f32 0.015625, %v299_v0  ;;  %v1784_v0 = vld [vmem:[#allocation2 + $0x30] sm:$0xff]  }
 0x4d1   :  { %v301_v2 = vsub.f32 %v294_v62, %v300_v1  ;;  %v1782_v62 = vld [vmem:[#allocation2 + $0x20] sm:$0xff]   ;;  %v1785_v1 = vld [vmem:[#allocation2 + $0x38] sm:$0xff]  }
 0x4d3   :  { %v302_v3 = vmul.f32 %v301_v2, %v301_v2 }
 0x4d5   :  { %v303_v4 = vsel %vm186_vm3, %v302_v3, 0.0 }
 0x4d6   :  { %304 = vadd.xlane.f32.xlu1 %v303_v4 }
 0x563   :  { %v305_v10 = vpop.xlane.xlu1 %304 }
 0x564   :  { %v306_v11 = vmul.f32 0.015625, %v305_v10 }
 0x566   :  { %v307_v12 = vadd.f32 1e-05, %v306_v11 }
 0x568   :  { %1820 = vrsqrt.f32 %v307_v12 }
 0x572   :  { %v1821_v13 = vpop.eup %1820 }
 0x573   :  { %v309_v15 = vmul.f32 %v1821_v13, %v301_v2 }
 0x575   :  { %v314_v17 = vmul.f32 %v1466_v14, %v309_v15  ;;  %v1484_v14 = vld [vmem:[%s2220_s6 + $0x6] ss:$0 sm:$0xff] }
 0x577   :  { %v2008_v18 = vadd.f32 %v1467_v16, %v314_v17 }
 0x579   :  { %v329_v19 = vpack.c.bf16 %v2008_v18, %v2008_v18 }
 0x57b   :  { %1643 = vmatmul.mubr.msk.bf16.vlgmr.msra.gmra.mrb[4].mxu1 %vm186_vm3, %v329_v19 }
 0x57c   :  { %1666 = vmatprep.mubr.msk.bf16.mxu1 %vm1890_vm1, %v1889_v9  ;;  %1659 = vmatpush3.bf16.msra.mxu1 %v1782_v62 }
 0x57d   :  { %1660 = vmatprep.subr.bf16.mxu1 %v1889_v9 }
 0x580   :  { %1661 = vmatpush3.bf16.msra.mxu1 %v1783_v63 }
 0x581   :  { %1662 = vmatprep.subr.bf16.mxu1 %v1889_v9 }
 0x584   :  { %1663 = vmatpush3.bf16.msra.mxu1 %v1784_v0  ;;  %v1498_v0 = vld [vmem:[%s2220_s6 + $0x12] ss:$0 sm:$0xff] }
 0x585   :  { %1664 = vmatprep.subr.bf16.mxu1 %v1889_v9 }
 0x588   :  { %1665 = vmatpush3.bf16.msra.mxu1 %v1785_v1 }
 0x589   :  { %1682 = vmatprep.subr.bf16.mxu1 %v1889_v9 }
 0x64e   :  { %v396_v21 = vpop.f32.mrb[4].mxu1 }
 0x64f   :  { %v397_v22 = vadd.f32 %v1468_v20, %v396_v21  ;;  %v1644_v23 = vpop.f32.mrb[5].mxu1 }
 0x650   :  { %v399_v24 = vpop.f32.mrb[6].mxu1 }
 0x651   :  { %v403_v25 = vmul.f32 0.1, %v397_v22  ;;  %v1645_v26 = vpop.f32.mrb[7].mxu1  ;;  %vm402_vm5 = vcmp.ge.f32.partialorder %v397_v22, 0.0 }
 0x653   :  { %v404_v27 = vsel %vm402_vm5, %v397_v22, %v403_v25 }
 0x654   :  { %v407_v28 = vsel %vm186_vm3, %v404_v27, 0.0 }
 0x655   :  { %408 = vadd.xlane.f32.xlu0 %v407_v28  ;;  %v1786_v28 = vld [vmem:[#allocation2 + $0x80] sm:$0xff]  }
 0x6e2   :  { %v409_v29 = vpop.xlane.xlu0 %408 }
 0x6e3   :  { %v410_v30 = vmul.f32 0.015625, %v409_v29  ;;  %v1787_v29 = vld [vmem:[#allocation2 + $0x88] sm:$0xff]  }
 0x6e5   :  { %v411_v31 = vsub.f32 %v404_v27, %v410_v30  ;;  %v1788_v30 = vld [vmem:[#allocation2 + $0x90] sm:$0xff]  }
 0x6e7   :  { %v412_v32 = vmul.f32 %v411_v31, %v411_v31 }
 0x6e9   :  { %v413_v33 = vsel %vm186_vm3, %v412_v32, 0.0 }
 0x6ea   :  { %414 = vadd.xlane.f32.xlu1 %v413_v33 }
 0x777   :  { %v415_v38 = vpop.xlane.xlu1 %414 }
 0x778   :  { %v416_v39 = vmul.f32 0.015625, %v415_v38  ;;  %v1491_v38 = vld [vmem:[%s2220_s6 + $0xc] ss:$0 sm:$0xff] }
 0x77a   :  { %v417_v40 = vadd.f32 1e-05, %v416_v39 }
 0x77c   :  { %1822 = vrsqrt.f32 %v417_v40 }
 0x786   :  { %v1823_v41 = vpop.eup %1822 }
 0x787   :  { %v419_v43 = vmul.f32 %v1823_v41, %v411_v31  ;;  %v1789_v31 = vld [vmem:[#allocation2 + $0x98] sm:$0xff]  }
 0x789   :  { %v424_v45 = vmul.f32 %v1474_v42, %v419_v43  ;;  %v1492_v42 = vld [vmem:[%s2220_s6 + $0xf] ss:$0 sm:$0xff] }
 0x78b   :  { %v429_v46 = vadd.f32 %v1475_v44, %v424_v45 }
 0x78d   :  { %v439_v47 = vpack.c.bf16 %v429_v46, %v429_v46 }
 0x78f   :  { %1655 = vmatmul.mubr.msk.bf16.vlgmr.msra.gmra.mrb[8].mxu0 %vm186_vm3, %v439_v47 }
 0x790   :  { %1678 = vmatprep.mubr.msk.bf16.mxu0 %vm1890_vm1, %v1889_v9  ;;  %1671 = vmatpush3.bf16.msra.mxu0 %v1786_v28 }
 0x791   :  { %1672 = vmatprep.subr.bf16.mxu0 %v1889_v9 }
 0x794   :  { %1673 = vmatpush3.bf16.msra.mxu0 %v1787_v29  ;;  %v1506_v29 = vld [vmem:[%s2220_s6 + $0x1b] ss:$0 sm:$0xff] }
 0x795   :  { %1674 = vmatprep.subr.bf16.mxu0 %v1889_v9 }
 0x798   :  { %1675 = vmatpush3.bf16.msra.mxu0 %v1788_v30 }
 0x799   :  { %1676 = vmatprep.subr.bf16.mxu0 %v1889_v9 }
 0x79c   :  { %1677 = vmatpush3.bf16.msra.mxu0 %v1789_v31  ;;  %v1507_v31 = vld [vmem:[%s2220_s6 + $0x1e] ss:$0 sm:$0xff] }
 0x79d   :  { %1694 = vmatprep.subr.bf16.mxu0 %v1889_v9 }
 0x862   :  { %v506_v49 = vpop.f32.mrb[8].mxu0 }
 0x863   :  { %v507_v50 = vadd.f32 %v1476_v48, %v506_v49  ;;  %v1656_v51 = vpop.f32.mrb[9].mxu0 }
 0x864   :  { %v509_v52 = vpop.f32.mrb[10].mxu0 }
 0x865   :  { %v513_v53 = vmul.f32 0.1, %v507_v50  ;;  %v1657_v54 = vpop.f32.mrb[11].mxu0  ;;  %vm512_vm6 = vcmp.ge.f32.partialorder %v507_v50, 0.0 }
 0x867   :  { %v514_v55 = vsel %vm512_vm6, %v507_v50, %v513_v53 }
 0x868   :  { %v517_v56 = vsel %vm186_vm3, %v514_v55, 0.0 }
 0x869   :  { %518 = vadd.xlane.f32.xlu0 %v517_v56  ;;  %v1790_v56 = vld [vmem:[#allocation2 + $0xe0] sm:$0xff]  }
 0x8f6   :  { %v519_v57 = vpop.xlane.xlu0 %518 }
 0x8f7   :  { %v520_v58 = vmul.f32 0.015625, %v519_v57  ;;  %v1791_v57 = vld [vmem:[#allocation2 + $0xe8] sm:$0xff]  }
 0x8f9   :  { %v521_v59 = vsub.f32 %v514_v55, %v520_v58  ;;  %v1792_v58 = vld [vmem:[#allocation2 + $0xf0] sm:$0xff]  }
 0x8fb   :  { %v522_v60 = vmul.f32 %v521_v59, %v521_v59 }
 0x8fd   :  { %v523_v61 = vsel %vm186_vm3, %v522_v60, 0.0 }
 0x8fe   :  { %524 = vadd.xlane.f32.xlu1 %v523_v61 }
 0x98b   :  { %v525_v2 = vpop.xlane.xlu1 %524 }
 0x98c   :  { %v526_v3 = vmul.f32 0.015625, %v525_v2  ;;  %v1499_v2 = vld [vmem:[%s2220_s6 + $0x15] ss:$0 sm:$0xff] }
 0x98e   :  { %v527_v4 = vadd.f32 1e-05, %v526_v3 }
 0x990   :  { %1824 = vrsqrt.f32 %v527_v4 }
 0x99a   :  { %v1825_v5 = vpop.eup %1824 }
 0x99b   :  { %v529_v7 = vmul.f32 %v1825_v5, %v521_v59  ;;  %v1793_v59 = vld [vmem:[#allocation2 + $0xf8] sm:$0xff]  }
 0x99d   :  { %v534_v10 = vmul.f32 %v1482_v6, %v529_v7  ;;  %v1500_v6 = vld [vmem:[%s2220_s6 + $0x18] ss:$0 sm:$0xff] }
 0x99f   :  { %v539_v11 = vadd.f32 %v1483_v8, %v534_v10 }
 0x9a1   :  { %v540_v12 = vadd.f32 %v539_v11, %v2008_v18 }
 0x9a3   :  { %v550_v13 = vpack.c.bf16 %v540_v12, %v540_v12 }
 0x9a5   :  { %1667 = vmatmul.mubr.msk.bf16.vlgmr.msra.gmra.mrb[8].mxu1 %vm186_vm3, %v550_v13 }
 0x9a6   :  { %1690 = vmatprep.mubr.msk.bf16.mxu1 %vm1890_vm1, %v1889_v9  ;;  %1683 = vmatpush3.bf16.msra.mxu1 %v1790_v56 }
 0x9a7   :  { %1684 = vmatprep.subr.bf16.mxu1 %v1889_v9 }
 0x9aa   :  { %1685 = vmatpush3.bf16.msra.mxu1 %v1791_v57 }
 0x9ab   :  { %1686 = vmatprep.subr.bf16.mxu1 %v1889_v9 }
 0x9ae   :  { %1687 = vmatpush3.bf16.msra.mxu1 %v1792_v58  ;;  %v1514_v58 = vld [vmem:[%s2220_s6 + $0xa] ss:$0 sm:$0xff] }
 0x9af   :  { %1688 = vmatprep.subr.bf16.mxu1 %v1889_v9 }
 0x9b2   :  { %1689 = vmatpush3.bf16.msra.mxu1 %v1793_v59 }
 0x9b3   :  { %1706 = vmatprep.subr.bf16.mxu1 %v1889_v9 }
 0xa78   :  { %v617_v15 = vpop.f32.mrb[8].mxu1 }
 0xa79   :  { %v618_v16 = vadd.f32 %v1484_v14, %v617_v15  ;;  %v1668_v17 = vpop.f32.mrb[9].mxu1 }
 0xa7a   :  { %v620_v19 = vpop.f32.mrb[10].mxu1 }
 0xa7b   :  { %v624_v20 = vmul.f32 0.1, %v618_v16  ;;  %v1669_v21 = vpop.f32.mrb[11].mxu1  ;;  %vm623_vm7 = vcmp.ge.f32.partialorder %v618_v16, 0.0 }
 0xa7d   :  { %v625_v22 = vsel %vm623_vm7, %v618_v16, %v624_v20 }
 0xa7e   :  { %v628_v18 = vsel %vm186_vm3, %v625_v22, 0.0 }
 0xa7f   :  { %629 = vadd.xlane.f32.xlu0 %v628_v18  ;;  %v1795_v18 = vld [vmem:[#allocation2 + $0x48] sm:$0xff]  }
 0xb0c   :  { %v630_v23 = vpop.xlane.xlu0 %629 }
 0xb0d   :  { %v631_v24 = vmul.f32 0.015625, %v630_v23  ;;  %v1796_v23 = vld [vmem:[#allocation2 + $0x50] sm:$0xff]  }
 0xb0f   :  { %v632_v25 = vsub.f32 %v625_v22, %v631_v24  ;;  %v1794_v22 = vld [vmem:[#allocation2 + $0x40] sm:$0xff]   ;;  %v1797_v24 = vld [vmem:[#allocation2 + $0x58] sm:$0xff]  }
 0xb11   :  { %v633_v26 = vmul.f32 %v632_v25, %v632_v25 }
 0xb13   :  { %v634_v27 = vsel %vm186_vm3, %v633_v26, 0.0 }
 0xb14   :  { %635 = vadd.xlane.f32.xlu1 %v634_v27 }
 0xba1   :  { %v636_v32 = vpop.xlane.xlu1 %635 }
 0xba2   :  { %v637_v33 = vmul.f32 0.015625, %v636_v32 }
 0xba4   :  { %v638_v34 = vadd.f32 1e-05, %v637_v33 }
 0xba6   :  { %1826 = vrsqrt.f32 %v638_v34 }
 0xbb0   :  { %v1827_v35 = vpop.eup %1826 }
 0xbb1   :  { %v640_v37 = vmul.f32 %v1827_v35, %v632_v25 }
 0xbb3   :  { %v645_v39 = vmul.f32 %v1490_v36, %v640_v37  ;;  %v1508_v36 = vld [vmem:[%s2220_s6 + $0x7] ss:$0 sm:$0xff] }
 0xbb5   :  { %v2067_v40 = vadd.f32 %v1491_v38, %v645_v39 }
 0xbb7   :  { %v660_v41 = vpack.c.bf16 %v2067_v40, %v2067_v40 }
 0xbb9   :  { %1679 = vmatmul.mubr.msk.bf16.vlgmr.msra.gmra.mrb[12].mxu0 %vm186_vm3, %v660_v41 }
 0xbba   :  { %1702 = vmatprep.mubr.msk.bf16.mxu0 %vm1890_vm1, %v1889_v9  ;;  %1695 = vmatpush3.bf16.msra.mxu0 %v1794_v22 }
 0xbbb   :  { %1696 = vmatprep.subr.bf16.mxu0 %v1889_v9 }
 0xbbe   :  { %1697 = vmatpush3.bf16.msra.mxu0 %v1795_v18 }
 0xbbf   :  { %1698 = vmatprep.subr.bf16.mxu0 %v1889_v9 }
 0xbc2   :  { %1699 = vmatpush3.bf16.msra.mxu0 %v1796_v23  ;;  %v1522_v23 = vld [vmem:[%s2220_s6 + $0x13] ss:$0 sm:$0xff] }
 0xbc3   :  { %1700 = vmatprep.subr.bf16.mxu0 %v1889_v9 }
 0xbc6   :  { %1701 = vmatpush3.bf16.msra.mxu0 %v1797_v24 }
 0xbc7   :  { %1718 = vmatprep.subr.bf16.mxu0 %v1889_v9 }
 0xc8c   :  { %v727_v43 = vpop.f32.mrb[12].mxu0 }
 0xc8d   :  { %v728_v44 = vadd.f32 %v1492_v42, %v727_v43  ;;  %v1680_v45 = vpop.f32.mrb[13].mxu0 }
 0xc8e   :  { %v730_v46 = vpop.f32.mrb[14].mxu0 }
 0xc8f   :  { %v734_v47 = vmul.f32 0.1, %v728_v44  ;;  %v1681_v48 = vpop.f32.mrb[15].mxu0  ;;  %vm733_vm8 = vcmp.ge.f32.partialorder %v728_v44, 0.0 }
 0xc91   :  { %v735_v49 = vsel %vm733_vm8, %v728_v44, %v734_v47 }
 0xc92   :  { %v738_v50 = vsel %vm186_vm3, %v735_v49, 0.0 }
 0xc93   :  { %739 = vadd.xlane.f32.xlu0 %v738_v50  ;;  %v1798_v50 = vld [vmem:[#allocation2 + $0xa0] sm:$0xff]  }
 0xd20   :  { %v740_v51 = vpop.xlane.xlu0 %739 }
 0xd21   :  { %v741_v52 = vmul.f32 0.015625, %v740_v51  ;;  %v1799_v51 = vld [vmem:[#allocation2 + $0xa8] sm:$0xff]  }
 0xd23   :  { %v742_v53 = vsub.f32 %v735_v49, %v741_v52  ;;  %v1800_v52 = vld [vmem:[#allocation2 + $0xb0] sm:$0xff]  }
 0xd25   :  { %v743_v54 = vmul.f32 %v742_v53, %v742_v53 }
 0xd27   :  { %v744_v55 = vsel %vm186_vm3, %v743_v54, 0.0 }
 0xd28   :  { %745 = vadd.xlane.f32.xlu1 %v744_v55 }
 0xdb5   :  { %v746_v60 = vpop.xlane.xlu1 %745 }
 0xdb6   :  { %v747_v61 = vmul.f32 0.015625, %v746_v60  ;;  %v1515_v60 = vld [vmem:[%s2220_s6 + $0xd] ss:$0 sm:$0xff] }
 0xdb8   :  { %v748_v62 = vadd.f32 1e-05, %v747_v61 }
 0xdba   :  { %1828 = vrsqrt.f32 %v748_v62 }
 0xdc4   :  { %v1829_v63 = vpop.eup %1828 }
 0xdc5   :  { %v750_v1 = vmul.f32 %v1829_v63, %v742_v53  ;;  %v1801_v53 = vld [vmem:[#allocation2 + $0xb8] sm:$0xff]  }
 0xdc7   :  { %v755_v3 = vmul.f32 %v1498_v0, %v750_v1  ;;  %v1516_v0 = vld [vmem:[%s2220_s6 + $0x10] ss:$0 sm:$0xff] }
 0xdc9   :  { %v760_v4 = vadd.f32 %v1499_v2, %v755_v3 }
 0xdcb   :  { %v770_v5 = vpack.c.bf16 %v760_v4, %v760_v4 }
 0xdcd   :  { %1691 = vmatmul.mubr.msk.bf16.vlgmr.msra.gmra.mrb[12].mxu1 %vm186_vm3, %v770_v5 }
 0xdce   :  { %1714 = vmatprep.mubr.msk.bf16.mxu1 %vm1890_vm1, %v1889_v9  ;;  %1707 = vmatpush3.bf16.msra.mxu1 %v1798_v50 }
 0xdcf   :  { %1708 = vmatprep.subr.bf16.mxu1 %v1889_v9 }
 0xdd2   :  { %1709 = vmatpush3.bf16.msra.mxu1 %v1799_v51 }
 0xdd3   :  { %1710 = vmatprep.subr.bf16.mxu1 %v1889_v9 }
 0xdd6   :  { %1711 = vmatpush3.bf16.msra.mxu1 %v1800_v52 }
 0xdd7   :  { %1712 = vmatprep.subr.bf16.mxu1 %v1889_v9 }
 0xdda   :  { %1713 = vmatpush3.bf16.msra.mxu1 %v1801_v53  ;;  %v1530_v53 = vld [vmem:[%s2220_s6 + $0x1c] ss:$0 sm:$0xff] }
 0xddb   :  { %1730 = vmatprep.subr.bf16.mxu1 %v1889_v9 }
 0xea0   :  { %v837_v7 = vpop.f32.mrb[12].mxu1 }
 0xea1   :  { %v838_v8 = vadd.f32 %v1500_v6, %v837_v7  ;;  %v1692_v10 = vpop.f32.mrb[13].mxu1 }
 0xea2   :  { %v840_v11 = vpop.f32.mrb[14].mxu1 }
 0xea3   :  { %v844_v12 = vmul.f32 0.1, %v838_v8  ;;  %v1693_v13 = vpop.f32.mrb[15].mxu1  ;;  %vm843_vm9 = vcmp.ge.f32.partialorder %v838_v8, 0.0 }
 0xea5   :  { %v845_v14 = vsel %vm843_vm9, %v838_v8, %v844_v12 }
 0xea6   :  { %v848_v15 = vsel %vm186_vm3, %v845_v14, 0.0 }
 0xea7   :  { %849 = vadd.xlane.f32.xlu0 %v848_v15  ;;  %v1802_v15 = vld [vmem:[#allocation2 + $0x100] sm:$0xff]  }
 0xf34   :  { %v850_v16 = vpop.xlane.xlu0 %849 }
 0xf35   :  { %v851_v17 = vmul.f32 0.015625, %v850_v16  ;;  %v1803_v16 = vld [vmem:[#allocation2 + $0x108] sm:$0xff]  }
 0xf37   :  { %v852_v19 = vsub.f32 %v845_v14, %v851_v17  ;;  %v1804_v17 = vld [vmem:[#allocation2 + $0x110] sm:$0xff]  }
 0xf39   :  { %v853_v20 = vmul.f32 %v852_v19, %v852_v19 }
 0xf3b   :  { %v854_v21 = vsel %vm186_vm3, %v853_v20, 0.0 }
 0xf3c   :  { %855 = vadd.xlane.f32.xlu1 %v854_v21 }
 0xfc9   :  { %v856_v25 = vpop.xlane.xlu1 %855 }
 0xfca   :  { %v857_v26 = vmul.f32 0.015625, %v856_v25  ;;  %v1523_v25 = vld [vmem:[%s2220_s6 + $0x16] ss:$0 sm:$0xff] }
 0xfcc   :  { %v858_v27 = vadd.f32 1e-05, %v857_v26 }
 0xfce   :  { %1830 = vrsqrt.f32 %v858_v27 }
 0xfd8   :  { %v1831_v28 = vpop.eup %1830 }
 0xfd9   :  { %v860_v30 = vmul.f32 %v1831_v28, %v852_v19  ;;  %v1805_v19 = vld [vmem:[#allocation2 + $0x118] sm:$0xff]  }
 0xfdb   :  { %v865_v32 = vmul.f32 %v1506_v29, %v860_v30  ;;  %v1524_v29 = vld [vmem:[%s2220_s6 + $0x19] ss:$0 sm:$0xff] }
 0xfdd   :  { %v870_v33 = vadd.f32 %v1507_v31, %v865_v32 }
 0xfdf   :  { %v871_v34 = vadd.f32 %v870_v33, %v2067_v40 }
 0xfe1   :  { %v881_v35 = vpack.c.bf16 %v871_v34, %v871_v34 }
 0xfe3   :  { %1703 = vmatmul.mubr.msk.bf16.vlgmr.msra.gmra.mrb[16].mxu0 %vm186_vm3, %v881_v35 }
 0xfe4   :  { %1726 = vmatprep.mubr.msk.bf16.mxu0 %vm1890_vm1, %v1889_v9  ;;  %1719 = vmatpush3.bf16.msra.mxu0 %v1802_v15 }
 0xfe5   :  { %1720 = vmatprep.subr.bf16.mxu0 %v1889_v9 }
 0xfe8   :  { %1721 = vmatpush3.bf16.msra.mxu0 %v1803_v16  ;;  %v1544_v16 = vld [vmem:[%s2220_s6 + $0x22] ss:$0 sm:$0xff] }
 0xfe9   :  { %1722 = vmatprep.subr.bf16.mxu0 %v1889_v9 }
 0xfec   :  { %1723 = vmatpush3.bf16.msra.mxu0 %v1804_v17 }
 0xfed   :  { %1724 = vmatprep.subr.bf16.mxu0 %v1889_v9 }
 0xff0   :  { %1725 = vmatpush3.bf16.msra.mxu0 %v1805_v19 }
 0xff1   :  { %1742 = vmatprep.subr.bf16.mxu0 %v1889_v9 }
0x10b6   :  { %v948_v37 = vpop.f32.mrb[16].mxu0 }
0x10b7   :  { %v949_v38 = vadd.f32 %v1508_v36, %v948_v37  ;;  %v1704_v39 = vpop.f32.mrb[17].mxu0 }
0x10b8   :  { %v951_v41 = vpop.f32.mrb[18].mxu0 }
0x10b9   :  { %v955_v42 = vmul.f32 0.1, %v949_v38  ;;  %v1705_v43 = vpop.f32.mrb[19].mxu0  ;;  %vm954_vm10 = vcmp.ge.f32.partialorder %v949_v38, 0.0 }
0x10bb   :  { %v956_v44 = vsel %vm954_vm10, %v949_v38, %v955_v42 }
0x10bc   :  { %v959_v40 = vsel %vm186_vm3, %v956_v44, 0.0 }
0x10bd   :  { %960 = vadd.xlane.f32.xlu0 %v959_v40  ;;  %v1807_v40 = vld [vmem:[#allocation2 + $0x128] sm:$0xff]  }
0x114a   :  { %v961_v45 = vpop.xlane.xlu0 %960 }
0x114b   :  { %v962_v46 = vmul.f32 0.015625, %v961_v45  ;;  %v1808_v45 = vld [vmem:[#allocation2 + $0x130] sm:$0xff]  }
0x114d   :  { %v963_v47 = vsub.f32 %v956_v44, %v962_v46  ;;  %v1806_v44 = vld [vmem:[#allocation2 + $0x120] sm:$0xff]   ;;  %v1809_v46 = vld [vmem:[#allocation2 + $0x138] sm:$0xff]  }
0x114f   :  { %v964_v48 = vmul.f32 %v963_v47, %v963_v47 }
0x1151   :  { %v965_v49 = vsel %vm186_vm3, %v964_v48, 0.0  ;;  %v1811_v48 = vld [vmem:[%s2218_s4 + $0x8] sm:$0xff]  }
0x1152   :  { %966 = vadd.xlane.f32.xlu1 %v965_v49 }
0x11df   :  { %v967_v54 = vpop.xlane.xlu1 %966 }
0x11e0   :  { %v968_v55 = vmul.f32 0.015625, %v967_v54 }
0x11e2   :  { %v969_v56 = vadd.f32 1e-05, %v968_v55  ;;  %v1531_v55 = vld [vmem:[%s2220_s6 + $0x1f] ss:$0 sm:$0xff] }
0x11e4   :  { %1832 = vrsqrt.f32 %v969_v56 }
0x11ee   :  { %v1833_v57 = vpop.eup %1832 }
0x11ef   :  { %v971_v59 = vmul.f32 %v1833_v57, %v963_v47  ;;  %v1810_v47 = vld [vmem:[%s2218_s4] sm:$0xff]  }
0x11f1   :  { %v976_v61 = vmul.f32 %v1514_v58, %v971_v59 }
0x11f3   :  { %v2126_v62 = vadd.f32 %v1515_v60, %v976_v61  ;;  %v1812_v60 = vld [vmem:[%s2218_s4 + $0x10] sm:$0xff]   ;;  %v1813_v61 = vld [vmem:[%s2218_s4 + $0x18] sm:$0xff]  }
0x11f5   :  { %v991_v63 = vpack.c.bf16 %v2126_v62, %v2126_v62 }
0x11f7   :  { %1715 = vmatmul.mubr.msk.bf16.vlgmr.msra.gmra.mrb[16].mxu1 %vm186_vm3, %v991_v63  ;;  %v1532_v63 = vld [vmem:[%s2220_s6 + $0x20] ss:$0 sm:$0xff] }
0x11f8   :  { %1738 = vmatprep.mubr.msk.bf16.mxu1 %vm1890_vm1, %v1889_v9  ;;  %1731 = vmatpush3.bf16.msra.mxu1 %v1806_v44 }
0x11f9   :  { %1732 = vmatprep.subr.bf16.mxu1 %v1889_v9 }
0x11fc   :  { %1733 = vmatpush3.bf16.msra.mxu1 %v1807_v40 }
0x11fd   :  { %1734 = vmatprep.subr.bf16.mxu1 %v1889_v9 }
0x1200   :  { %1735 = vmatpush3.bf16.msra.mxu1 %v1808_v45 }
0x1201   :  { %1736 = vmatprep.subr.bf16.mxu1 %v1889_v9 }
0x1204   :  { %1737 = vmatpush3.bf16.msra.mxu1 %v1809_v46 }
0x1205   :  { %1754 = vmatprep.subr.bf16.mxu1 %v1889_v9 }
0x12ca   :  { %v1058_v1 = vpop.f32.mrb[16].mxu1 }
0x12cb   :  { %v1059_v2 = vadd.f32 %v1516_v0, %v1058_v1  ;;  %v1716_v3 = vpop.f32.mrb[17].mxu1 }
0x12cc   :  { %v1061_v4 = vpop.f32.mrb[18].mxu1 }
0x12cd   :  { %v1065_v5 = vmul.f32 0.1, %v1059_v2  ;;  %v1717_v6 = vpop.f32.mrb[19].mxu1  ;;  %vm1064_vm11 = vcmp.ge.f32.partialorder %v1059_v2, 0.0 }
0x12cf   :  { %v1066_v7 = vsel %vm1064_vm11, %v1059_v2, %v1065_v5 }
0x12d0   :  { %v1069_v8 = vsel %vm186_vm3, %v1066_v7, 0.0 }
0x12d1   :  { %1070 = vadd.xlane.f32.xlu0 %v1069_v8 }
0x135e   :  { %v1071_v10 = vpop.xlane.xlu0 %1070 }
0x135f   :  { %v1072_v11 = vmul.f32 0.015625, %v1071_v10 }
0x1361   :  { %v1073_v12 = vsub.f32 %v1066_v7, %v1072_v11  ;;  %v1815_v7 = vld [vmem:[%s2219_s5 + $0x8] sm:$0xff]  }
0x1363   :  { %v1074_v13 = vmul.f32 %v1073_v12, %v1073_v12 }
0x1365   :  { %v1075_v14 = vsel %vm186_vm3, %v1074_v13, 0.0 }
0x1366   :  { %1076 = vadd.xlane.f32.xlu1 %v1075_v14 }
0x13f3   :  { %v1077_v20 = vpop.xlane.xlu1 %1076 }
0x13f4   :  { %v1078_v21 = vmul.f32 0.015625, %v1077_v20 }
0x13f6   :  { %v1079_v22 = vadd.f32 1e-05, %v1078_v21 }
0x13f8   :  { %1834 = vrsqrt.f32 %v1079_v22 }
0x1402   :  { %v1835_v18 = vpop.eup %1834 }
0x1403   :  { %v1081_v24 = vmul.f32 %v1835_v18, %v1073_v12 }
0x1405   :  { %v1086_v26 = vmul.f32 %v1522_v23, %v1081_v24 }
0x1407   :  { %v1091_v27 = vadd.f32 %v1523_v25, %v1086_v26 }
0x1409   :  { %v1101_v28 = vpack.c.bf16 %v1091_v27, %v1091_v27 }
0x140b   :  { %1727 = vmatmul.mubr.msk.bf16.vlgmr.msra.gmra.mrb[20].mxu0 %vm186_vm3, %v1101_v28 }
0x140c   :  { %1750 = vmatprep.mubr.msk.bf16.mxu0 %vm1890_vm1, %v1889_v9  ;;  %1743 = vmatpush3.bf16.msra.mxu0 %v1810_v47 }
0x140d   :  { %1744 = vmatprep.subr.bf16.mxu0 %v1889_v9 }
0x1410   :  { %1745 = vmatpush3.bf16.msra.mxu0 %v1811_v48 }
0x1411   :  { %1746 = vmatprep.subr.bf16.mxu0 %v1889_v9 }
0x1414   :  { %1747 = vmatpush3.bf16.msra.mxu0 %v1812_v60 }
0x1415   :  { %1748 = vmatprep.subr.bf16.mxu0 %v1889_v9 }
0x1418   :  { %1749 = vmatpush3.bf16.msra.mxu0 %v1813_v61 }
0x14de   :  { %v1168_v30 = vpop.f32.mrb[20].mxu0 }
0x14df   :  { %v1169_v31 = vadd.f32 %v1524_v29, %v1168_v30  ;;  %v1728_v32 = vpop.f32.mrb[21].mxu0 }
0x14e0   :  { %v1171_v33 = vpop.f32.mrb[22].mxu0 }
0x14e1   :  { %v1175_v34 = vmul.f32 0.1, %v1169_v31  ;;  %v1729_v35 = vpop.f32.mrb[23].mxu0  ;;  %vm1174_vm12 = vcmp.ge.f32.partialorder %v1169_v31, 0.0 }
0x14e3   :  { %v1176_v36 = vsel %vm1174_vm12, %v1169_v31, %v1175_v34 }
0x14e4   :  { %v1179_v37 = vsel %vm186_vm3, %v1176_v36, 0.0 }
0x14e5   :  { %1180 = vadd.xlane.f32.xlu0 %v1179_v37 }
0x1572   :  { %v1181_v38 = vpop.xlane.xlu0 %1180 }
0x1573   :  { %v1182_v39 = vmul.f32 0.015625, %v1181_v38 }
0x1575   :  { %v1183_v41 = vsub.f32 %v1176_v36, %v1182_v39 }
0x1577   :  { %v1184_v42 = vmul.f32 %v1183_v41, %v1183_v41 }
0x1579   :  { %v1185_v43 = vsel %vm186_vm3, %v1184_v42, 0.0 }
0x157a   :  { %1186 = vadd.xlane.f32.xlu1 %v1185_v43 }
0x1607   :  { %v1187_v49 = vpop.xlane.xlu1 %1186 }
0x1608   :  { %v1188_v50 = vmul.f32 0.015625, %v1187_v49 }
0x160a   :  { %v1189_v51 = vadd.f32 1e-05, %v1188_v50 }
0x160c   :  { %1836 = vrsqrt.f32 %v1189_v51 }
0x1616   :  { %v1837_v52 = vpop.eup %1836 }
0x1617   :  { %v1191_v54 = vmul.f32 %v1837_v52, %v1183_v41 }
0x1619   :  { %v1196_v56 = vmul.f32 %v1530_v53, %v1191_v54 }
0x161b   :  { %v1201_v57 = vadd.f32 %v1531_v55, %v1196_v56 }
0x161d   :  { %v1202_v58 = vadd.f32 %v1201_v57, %v2126_v62  ;;  %v1814_v62 = vld [vmem:[%s2219_s5] sm:$0xff]   ;;  %s1442_s5 = sshll.u32 %s1891_s0, 4  ;;  %s1443_s5 = int_to_ptr.vmem [resolvable:$true] %s1442_s5 }
0x161e   :  { %s1860_s1 = scalar_lea.vmem %s1443_s5, 128  ;;  %p1865_p9 = scmp.lt.s32.totalorder %s1443_s5, %s1443_s5 }
0x161f   :  { %v1212_v59 = vpack.c.bf16 %v1202_v58, %v1202_v58  ;;  %p1861_p8 = scmp.ne.s32.totalorder %s1443_s5, %s1860_s1  ;;  %p1866_p10 = scmp.lt.s32.totalorder %s1860_s1, %s1860_s1 }
0x1621   :  { %1739 = vmatmul.mubr.msk.bf16.vlgmr.msra.gmra.mrb[20].mxu1 %vm186_vm3, %v1212_v59  ;;  %p1867_p11 = por %p1866_p10, %p1865_p9 }
0x1622   :  { %1758 = vmatprep.mubr.msk.bf16.mxu1 %vm1890_vm1, %v1889_v9  ;;  %1755 = vmatpush3.bf16.msra.mxu1 %v1814_v62 }
0x1623   :  { %1756 = vmatprep.subr.bf16.mxu1 %v1889_v9  ;;  %v1538_v9 = vld [vmem:[%s2220_s6 + $0x21] ss:$0 sm:$0xff]  ;;  %p1868_p12 = pnand %p1867_p11, %p1861_p8 }
0x1626   :  { %1757 = vmatpush3.bf16.msra.mxu1 %v1815_v7 }
0x16f4   :  { %v1279_v0 = vpop.f32.mrb[20].mxu1 }
0x16f5   :  { %v1280_v1 = vadd.f32 %v1532_v63, %v1279_v0  ;;  %v1740_v2 = vpop.f32.mrb[21].mxu1 }
0x16f6   :  { %v1282_v3 = vpop.f32.mrb[22].mxu1 }
0x16f7   :  { %v1285_v4 = vmax.f32 %v1280_v1, 0.0  ;;  %v1741_v5 = vpop.f32.mrb[23].mxu1 }
0x16f9   :  { %v1294_v6 = vpack.c.bf16 %v1285_v4, %v1285_v4 }
0x16fb   :  { %1751 = vmatmul.mubr.msk.bf16.vlgmr.msra.gmra.mrb[24].mxu0 %vm186_vm3, %v1294_v6 }
0x17ce   :  { %v1361_v8 = vpop.f32.mrb[24].mxu0 }
0x17cf   :  { %v1362_v10 = vadd.f32 %v1538_v9, %v1361_v8  ;;  %v1752_v11 = vpop.f32.mrb[25].mxu0 }
0x17d0   :  { %v1364_v12 = vpop.f32.mrb[26].mxu0 }
0x17d1   :  { %v1367_v13 = vmax.f32 %v1362_v10, 0.0  ;;  %v1753_v14 = vpop.f32.mrb[27].mxu0 }
0x17d3   :  { %v1372_v15 = vpack.c.bf16 %v1367_v13, %v1367_v13 }
0x17d5   :  { %1759 = vmatmul.mubr.msk.bf16.vlgmr.msra.gmra.mrb[24].mxu1 %vm1390_vm13, %v1372_v15 }
0x18a8   :  { %v1428_v17 = vpop.f32.mrb[24].mxu1 }
0x18a9   :  { %v1429_v19 = vadd.f32 %v1544_v16, %v1428_v17  ;;  %v1760_v20 = vpop.f32.mrb[25].mxu1 }
0x18aa   :  { %v1431_v21 = vpop.f32.mrb[26].mxu1 }
0x18ab   :  { %v1761_v22 = vpop.f32.mrb[27].mxu1  ;;  %1435 = vst.msk [vmem:[#allocation5] sm:$0xff] %vm1434_vm14, %v1429_v19 }
0x18ac   :  { %1871 = shalt.err (!%p1868_p12)
}
0x18ad   :  { %s1872_s6 = scalar_lea.hbm %s2221_s7, 128 }
0x18ae   :  { %p1873_p13 = scmp.ne.s32.totalorder %s2221_s7, %s1872_s6  ;;  %p1876_p0 = scmp.lt.u32.totalorder %s1872_s6, %s2221_s7 }
0x18b0   :  { %p1878_p1 = pnand %p1876_p0, %p1873_p13 }
0x18b2   :  { %1881 = shalt.err (!%p1878_p1)
}
0x18b3   :  { %1445 = dma.vmem_to_hbm [thread:$0]  %s1443_s5, 128, %s2221_s7, [#allocation4]  }
0x18b4   :  { %1884 = dma.done.wait [#allocation4], 128  }
0x18b5   :  { %1885 = vsyncadd [#allocation4], 4294967168 }
0x18b6   :  { %1449 = vsyncpa [#allocation3], 1 }
0x18b7   :  { %1450 = vsyncpa [#allocation4], 1 }

</bundles_post_ra>
